<compile_context>
chip_gen: v7x
topology: tpu7x:2x2x1
jax: 0.10.0
libtpu: 0.0.40
codegen_flags: <defaults>
</compile_context>

<pallas_src>
import functools

import jax
import jax.numpy as jnp
from jax.experimental import pallas as pl
from jax.experimental.pallas import tpu as pltpu

IN_CH = 5
IN_CH_PAD = 8                         # pad channels to one full sublane tile
HIDDEN = 16
# nn.ModuleList order in the module: kernels[4], kernels[3], ..., kernels[0]
KERNEL_SIZES = (59, 49, 39, 21, 9)
K_MAX = max(KERNEL_SIZES)             # 59
MAX_PAD = (K_MAX - 1) // 2            # 29


def _slot_head_kernel(x_ref, w_ref, b_ref, o_ref, xcol_ref, *, seq_len, b_tile):
    """Fused slot_head: one im2col build + one MXU matmul per grid step.

    x_ref   : (b_tile, IN_CH_PAD, L + 2*MAX_PAD)  zero-padded input
    w_ref   : (OUT, K_MAX * IN_CH_PAD)            fused conv+1x1 weight
    b_ref   : (OUT, 1)                            1x1 conv bias
    o_ref   : (b_tile, OUT, L)                    output
    xcol_ref: (K_MAX * IN_CH_PAD, b_tile * L)     im2col VMEM scratch
    """
    L = seq_len
    # Build im2col: xcol[k*8 + c, b*L + l] = x[b, c, k + l].
    # Each store targets a sublane-aligned (8, L) block of the scratch.
    for b in range(b_tile):
        xb = x_ref[b]                                   # (IN_CH_PAD, Lpad)
        for k in range(K_MAX):
            xcol_ref[k * IN_CH_PAD:(k + 1) * IN_CH_PAD,
                     b * L:(b + 1) * L] = xb[:, k:k + L]
    # Single matmul: (OUT, 472) @ (472, b_tile*L) with f32 accumulate, + bias.
    out = jnp.dot(w_ref[...], xcol_ref[...],
                  preferred_element_type=jnp.float32) + b_ref[...]
    for b in range(b_tile):
        o_ref[b] = out[:, b * L:(b + 1) * L].astype(o_ref.dtype)


def _fuse_weights(conv_weights, w1x1):
    """Fold the five 'same' convs and the 1x1 conv into one (OUT, K_MAX*8) matrix.

    Row ordering matches the kernel's im2col: r = k * IN_CH_PAD + c.
    """
    padded = []
    for w, K in zip(conv_weights, KERNEL_SIZES):
        off = (K_MAX - K) // 2        # center this branch inside a K_MAX window
        padded.append(jnp.pad(w, ((0, 0), (0, 0), (off, K_MAX - K - off))))
    w_all = jnp.concatenate(padded, axis=0)                      # (80, IN_CH, K_MAX)
    w_fused = jnp.einsum('oh,hck->ock', w1x1, w_all,
                         precision=jax.lax.Precision.HIGHEST)    # (OUT, IN_CH, K_MAX)
    w_fused = jnp.pad(w_fused, ((0, 0), (0, IN_CH_PAD - IN_CH), (0, 0)))
    w_flat = jnp.transpose(w_fused, (0, 2, 1)).reshape(
        w_fused.shape[0], K_MAX * IN_CH_PAD)                     # (OUT, 472)
    return w_flat


def slot_head_forward(x, conv_weights, w1x1, b1x1, *, b_tile=1):
    """x: (N, IN_CH, L) float32 -> (N, OUT, L) float32."""
    N, C, L = x.shape
    assert C == IN_CH
    assert N % b_tile == 0
    out_ch = w1x1.shape[0]

    # Pad channels to a sublane tile and length by MAX_PAD on each side.
    x_pad = jnp.pad(x, ((0, 0), (0, IN_CH_PAD - IN_CH), (MAX_PAD, MAX_PAD)))
    Lpad = L + 2 * MAX_PAD

    w_flat = _fuse_weights(conv_weights, w1x1)
    b_col = b1x1.reshape(out_ch, 1)

    kernel = functools.partial(_slot_head_kernel, seq_len=L, b_tile=b_tile)

    return pl.pallas_call(
        kernel,
        out_shape=jax.ShapeDtypeStruct((N, out_ch, L), jnp.float32),
        grid_spec=pltpu.PrefetchScalarGridSpec(
            num_scalar_prefetch=0,
            grid=(N // b_tile,),
            in_specs=[
                pl.BlockSpec((b_tile, IN_CH_PAD, Lpad), lambda n: (n, 0, 0)),
                pl.BlockSpec((out_ch, K_MAX * IN_CH_PAD), lambda n: (0, 0)),
                pl.BlockSpec((out_ch, 1), lambda n: (0, 0)),
            ],
            out_specs=pl.BlockSpec((b_tile, out_ch, L), lambda n: (n, 0, 0)),
            scratch_shapes=[
                pltpu.VMEM((K_MAX * IN_CH_PAD, b_tile * L), jnp.float32)],
        ),
        compiler_params=pltpu.CompilerParams(
            dimension_semantics=("parallel",)),
    )(x_pad, w_flat, b_col)


def slot_head_reference(x, conv_weights, w1x1, b1x1):
    """Pure-JAX reference (matches PyTorch semantics)."""
    hs = []
    for w in conv_weights:
        h = jax.lax.conv_general_dilated(
            x, w, window_strides=(1,), padding='SAME',
            dimension_numbers=('NCH', 'OIH', 'NCH'),
            precision=jax.lax.Precision.HIGHEST)
        hs.append(h)
    h = jnp.concatenate(hs, axis=1)                    # (N, 80, L)
    out = jnp.einsum('oc,ncl->nol', w1x1, h,
                     precision=jax.lax.Precision.HIGHEST) + b1x1[None, :, None]
    return out


if __name__ == "__main__":
    # Small, module-consistent shapes: batch=2, in_channels=5 (fixed by the
    # module), seq length=128, out_channels=8, hidden_channels=16.
    N, L, OUT = 2, 128, 8

    key = jax.random.PRNGKey(0)
    keys = jax.random.split(key, 8)

    x = jax.random.normal(keys[0], (N, IN_CH, L), dtype=jnp.float32)

    # Deterministic synthetic parameters (shapes match nn.Conv1d weights).
    conv_weights = []
    for i, K in enumerate(KERNEL_SIZES):
        w = jax.random.normal(keys[1 + i], (HIDDEN, IN_CH, K),
                              dtype=jnp.float32) * (1.0 / (IN_CH * K)) ** 0.5
        conv_weights.append(w)
    w1x1 = jax.random.normal(keys[6], (OUT, 5 * HIDDEN),
                             dtype=jnp.float32) * (1.0 / (5 * HIDDEN)) ** 0.5
    b1x1 = jax.random.normal(keys[7], (OUT,), dtype=jnp.float32) * 0.01

    ref = slot_head_reference(x, conv_weights, w1x1, b1x1)

    # b_tile=1: grid=(N,), batch axis stays "parallel" (both v7x TCs get work).
    out1 = jax.block_until_ready(
        slot_head_forward(x, conv_weights, w1x1, b1x1, b_tile=1))
    assert out1.shape == (N, OUT, L)
    assert jnp.allclose(out1, ref, atol=5e-4, rtol=5e-4), (
        float(jnp.max(jnp.abs(out1 - ref))))

    # b_tile=N: single grid step, lane-dense N*L matmul (batch-amortized path).
    out2 = jax.block_until_ready(
        slot_head_forward(x, conv_weights, w1x1, b1x1, b_tile=N))
    assert jnp.allclose(out2, ref, atol=5e-4, rtol=5e-4), (
        float(jnp.max(jnp.abs(out2 - ref))))

    print("KERNEL_OK")
</pallas_src>

<mosaic_0001>
module attributes {stable_mosaic.version = 11 : i64} {
  func.func @_slot_head_kernel(%arg0: i32, %arg1: memref<1x8x186xf32, #tpu.memory_space<vmem>>, %arg2: memref<8x472xf32, #tpu.memory_space<vmem>>, %arg3: memref<8x1xf32, #tpu.memory_space<vmem>>, %arg4: memref<1x8x128xf32, #tpu.memory_space<vmem>>, %arg5: memref<472x128xf32, #tpu.memory_space<vmem>>) attributes {dimension_semantics = [#tpu.dimension_semantics<parallel>], iteration_bounds = array<i64: 2>, scalar_prefetch = 0 : i64, scratch_operands = 1 : i64, tpu.core_type = #tpu.core_type<tc>, window_params = [{transform_indices = @transform_0, window_bounds = array<i64: 1, 8, 186>}, {pipeline_mode = #tpu.pipeline_mode<synchronous>, transform_indices = @transform_1, window_bounds = array<i64: 8, 472>}, {pipeline_mode = #tpu.pipeline_mode<synchronous>, transform_indices = @transform_2, window_bounds = array<i64: 8, 1>}, {transform_indices = @transform_3, window_bounds = array<i64: 1, 8, 128>}]} {
    %c0 = arith.constant 0 : index
    %c0_0 = arith.constant 0 : index
    %c0_1 = arith.constant 0 : index
    %0 = vector.load %arg1[%c0, %c0_0, %c0_1] : memref<1x8x186xf32, #tpu.memory_space<vmem>>, vector<1x8x186xf32>
    %1 = vector.shape_cast %0 : vector<1x8x186xf32> to vector<8x186xf32>
    %2 = vector.extract_strided_slice %1 {offsets = [0, 0], sizes = [8, 128], strides = [1, 1]} : vector<8x186xf32> to vector<8x128xf32>
    %c0_2 = arith.constant 0 : index
    %c0_3 = arith.constant 0 : index
    %3 = vector.load %arg5[%c0_2, %c0_3] : memref<472x128xf32, #tpu.memory_space<vmem>>, vector<8x128xf32>
    tpu.vector_store %arg5[%c0_2, %c0_3], %2 {strides = array<i32>} : memref<472x128xf32, #tpu.memory_space<vmem>>, vector<8x128xf32>,
    %4 = vector.extract_strided_slice %1 {offsets = [0, 1], sizes = [8, 128], strides = [1, 1]} : vector<8x186xf32> to vector<8x128xf32>
    %c8 = arith.constant 8 : index
    %c0_4 = arith.constant 0 : index
    %5 = vector.load %arg5[%c8, %c0_4] : memref<472x128xf32, #tpu.memory_space<vmem>>, vector<8x128xf32>
    tpu.vector_store %arg5[%c8, %c0_4], %4 {strides = array<i32>} : memref<472x128xf32, #tpu.memory_space<vmem>>, vector<8x128xf32>,
    %6 = vector.extract_strided_slice %1 {offsets = [0, 2], sizes = [8, 128], strides = [1, 1]} : vector<8x186xf32> to vector<8x128xf32>
    %c16 = arith.constant 16 : index
    %c0_5 = arith.constant 0 : index
    %7 = vector.load %arg5[%c16, %c0_5] : memref<472x128xf32, #tpu.memory_space<vmem>>, vector<8x128xf32>
    tpu.vector_store %arg5[%c16, %c0_5], %6 {strides = array<i32>} : memref<472x128xf32, #tpu.memory_space<vmem>>, vector<8x128xf32>,
    %8 = vector.extract_strided_slice %1 {offsets = [0, 3], sizes = [8, 128], strides = [1, 1]} : vector<8x186xf32> to vector<8x128xf32>
    %c24 = arith.constant 24 : index
    %c0_6 = arith.constant 0 : index
    %9 = vector.load %arg5[%c24, %c0_6] : memref<472x128xf32, #tpu.memory_space<vmem>>, vector<8x128xf32>
    tpu.vector_store %arg5[%c24, %c0_6], %8 {strides = array<i32>} : memref<472x128xf32, #tpu.memory_space<vmem>>, vector<8x128xf32>,
    %10 = vector.extract_strided_slice %1 {offsets = [0, 4], sizes = [8, 128], strides = [1, 1]} : vector<8x186xf32> to vector<8x128xf32>
    %c32 = arith.constant 32 : index
    %c0_7 = arith.constant 0 : index
    %11 = vector.load %arg5[%c32, %c0_7] : memref<472x128xf32, #tpu.memory_space<vmem>>, vector<8x128xf32>
    tpu.vector_store %arg5[%c32, %c0_7], %10 {strides = array<i32>} : memref<472x128xf32, #tpu.memory_space<vmem>>, vector<8x128xf32>,
    %12 = vector.extract_strided_slice %1 {offsets = [0, 5], sizes = [8, 128], strides = [1, 1]} : vector<8x186xf32> to vector<8x128xf32>
    %c40 = arith.constant 40 : index
    %c0_8 = arith.constant 0 : index
    %13 = vector.load %arg5[%c40, %c0_8] : memref<472x128xf32, #tpu.memory_space<vmem>>, vector<8x128xf32>
    tpu.vector_store %arg5[%c40, %c0_8], %12 {strides = array<i32>} : memref<472x128xf32, #tpu.memory_space<vmem>>, vector<8x128xf32>,
    %14 = vector.extract_strided_slice %1 {offsets = [0, 6], sizes = [8, 128], strides = [1, 1]} : vector<8x186xf32> to vector<8x128xf32>
    %c48 = arith.constant 48 : index
    %c0_9 = arith.constant 0 : index
    %15 = vector.load %arg5[%c48, %c0_9] : memref<472x128xf32, #tpu.memory_space<vmem>>, vector<8x128xf32>
    tpu.vector_store %arg5[%c48, %c0_9], %14 {strides = array<i32>} : memref<472x128xf32, #tpu.memory_space<vmem>>, vector<8x128xf32>,
    %16 = vector.extract_strided_slice %1 {offsets = [0, 7], sizes = [8, 128], strides = [1, 1]} : vector<8x186xf32> to vector<8x128xf32>
    %c56 = arith.constant 56 : index
    %c0_10 = arith.constant 0 : index
    %17 = vector.load %arg5[%c56, %c0_10] : memref<472x128xf32, #tpu.memory_space<vmem>>, vector<8x128xf32>
    tpu.vector_store %arg5[%c56, %c0_10], %16 {strides = array<i32>} : memref<472x128xf32, #tpu.memory_space<vmem>>, vector<8x128xf32>,
    %18 = vector.extract_strided_slice %1 {offsets = [0, 8], sizes = [8, 128], strides = [1, 1]} : vector<8x186xf32> to vector<8x128xf32>
    %c64 = arith.constant 64 : index
    %c0_11 = arith.constant 0 : index
    %19 = vector.load %arg5[%c64, %c0_11] : memref<472x128xf32, #tpu.memory_space<vmem>>, vector<8x128xf32>
    tpu.vector_store %arg5[%c64, %c0_11], %18 {strides = array<i32>} : memref<472x128xf32, #tpu.memory_space<vmem>>, vector<8x128xf32>,
    %20 = vector.extract_strided_slice %1 {offsets = [0, 9], sizes = [8, 128], strides = [1, 1]} : vector<8x186xf32> to vector<8x128xf32>
    %c72 = arith.constant 72 : index
    %c0_12 = arith.constant 0 : index
    %21 = vector.load %arg5[%c72, %c0_12] : memref<472x128xf32, #tpu.memory_space<vmem>>, vector<8x128xf32>
    tpu.vector_store %arg5[%c72, %c0_12], %20 {strides = array<i32>} : memref<472x128xf32, #tpu.memory_space<vmem>>, vector<8x128xf32>,
    %22 = vector.extract_strided_slice %1 {offsets = [0, 10], sizes = [8, 128], strides = [1, 1]} : vector<8x186xf32> to vector<8x128xf32>
    %c80 = arith.constant 80 : index
    %c0_13 = arith.constant 0 : index
    %23 = vector.load %arg5[%c80, %c0_13] : memref<472x128xf32, #tpu.memory_space<vmem>>, vector<8x128xf32>
    tpu.vector_store %arg5[%c80, %c0_13], %22 {strides = array<i32>} : memref<472x128xf32, #tpu.memory_space<vmem>>, vector<8x128xf32>,
    %24 = vector.extract_strided_slice %1 {offsets = [0, 11], sizes = [8, 128], strides = [1, 1]} : vector<8x186xf32> to vector<8x128xf32>
    %c88 = arith.constant 88 : index
    %c0_14 = arith.constant 0 : index
    %25 = vector.load %arg5[%c88, %c0_14] : memref<472x128xf32, #tpu.memory_space<vmem>>, vector<8x128xf32>
    tpu.vector_store %arg5[%c88, %c0_14], %24 {strides = array<i32>} : memref<472x128xf32, #tpu.memory_space<vmem>>, vector<8x128xf32>,
    %26 = vector.extract_strided_slice %1 {offsets = [0, 12], sizes = [8, 128], strides = [1, 1]} : vector<8x186xf32> to vector<8x128xf32>
    %c96 = arith.constant 96 : index
    %c0_15 = arith.constant 0 : index
    %27 = vector.load %arg5[%c96, %c0_15] : memref<472x128xf32, #tpu.memory_space<vmem>>, vector<8x128xf32>
    tpu.vector_store %arg5[%c96, %c0_15], %26 {strides = array<i32>} : memref<472x128xf32, #tpu.memory_space<vmem>>, vector<8x128xf32>,
    %28 = vector.extract_strided_slice %1 {offsets = [0, 13], sizes = [8, 128], strides = [1, 1]} : vector<8x186xf32> to vector<8x128xf32>
    %c104 = arith.constant 104 : index
    %c0_16 = arith.constant 0 : index
    %29 = vector.load %arg5[%c104, %c0_16] : memref<472x128xf32, #tpu.memory_space<vmem>>, vector<8x128xf32>
    tpu.vector_store %arg5[%c104, %c0_16], %28 {strides = array<i32>} : memref<472x128xf32, #tpu.memory_space<vmem>>, vector<8x128xf32>,
    %30 = vector.extract_strided_slice %1 {offsets = [0, 14], sizes = [8, 128], strides = [1, 1]} : vector<8x186xf32> to vector<8x128xf32>
    %c112 = arith.constant 112 : index
    %c0_17 = arith.constant 0 : index
    %31 = vector.load %arg5[%c112, %c0_17] : memref<472x128xf32, #tpu.memory_space<vmem>>, vector<8x128xf32>
    tpu.vector_store %arg5[%c112, %c0_17], %30 {strides = array<i32>} : memref<472x128xf32, #tpu.memory_space<vmem>>, vector<8x128xf32>,
    %32 = vector.extract_strided_slice %1 {offsets = [0, 15], sizes = [8, 128], strides = [1, 1]} : vector<8x186xf32> to vector<8x128xf32>
    %c120 = arith.constant 120 : index
    %c0_18 = arith.constant 0 : index
    %33 = vector.load %arg5[%c120, %c0_18] : memref<472x128xf32, #tpu.memory_space<vmem>>, vector<8x128xf32>
    tpu.vector_store %arg5[%c120, %c0_18], %32 {strides = array<i32>} : memref<472x128xf32, #tpu.memory_space<vmem>>, vector<8x128xf32>,
    %34 = vector.extract_strided_slice %1 {offsets = [0, 16], sizes = [8, 128], strides = [1, 1]} : vector<8x186xf32> to vector<8x128xf32>
    %c128 = arith.constant 128 : index
    %c0_19 = arith.constant 0 : index
    %35 = vector.load %arg5[%c128, %c0_19] : memref<472x128xf32, #tpu.memory_space<vmem>>, vector<8x128xf32>
    tpu.vector_store %arg5[%c128, %c0_19], %34 {strides = array<i32>} : memref<472x128xf32, #tpu.memory_space<vmem>>, vector<8x128xf32>,
    %36 = vector.extract_strided_slice %1 {offsets = [0, 17], sizes = [8, 128], strides = [1, 1]} : vector<8x186xf32> to vector<8x128xf32>
    %c136 = arith.constant 136 : index
    %c0_20 = arith.constant 0 : index
    %37 = vector.load %arg5[%c136, %c0_20] : memref<472x128xf32, #tpu.memory_space<vmem>>, vector<8x128xf32>
    tpu.vector_store %arg5[%c136, %c0_20], %36 {strides = array<i32>} : memref<472x128xf32, #tpu.memory_space<vmem>>, vector<8x128xf32>,
    %38 = vector.extract_strided_slice %1 {offsets = [0, 18], sizes = [8, 128], strides = [1, 1]} : vector<8x186xf32> to vector<8x128xf32>
    %c144 = arith.constant 144 : index
    %c0_21 = arith.constant 0 : index
    %39 = vector.load %arg5[%c144, %c0_21] : memref<472x128xf32, #tpu.memory_space<vmem>>, vector<8x128xf32>
    tpu.vector_store %arg5[%c144, %c0_21], %38 {strides = array<i32>} : memref<472x128xf32, #tpu.memory_space<vmem>>, vector<8x128xf32>,
    %40 = vector.extract_strided_slice %1 {offsets = [0, 19], sizes = [8, 128], strides = [1, 1]} : vector<8x186xf32> to vector<8x128xf32>
    %c152 = arith.constant 152 : index
    %c0_22 = arith.constant 0 : index
    %41 = vector.load %arg5[%c152, %c0_22] : memref<472x128xf32, #tpu.memory_space<vmem>>, vector<8x128xf32>
    tpu.vector_store %arg5[%c152, %c0_22], %40 {strides = array<i32>} : memref<472x128xf32, #tpu.memory_space<vmem>>, vector<8x128xf32>,
    %42 = vector.extract_strided_slice %1 {offsets = [0, 20], sizes = [8, 128], strides = [1, 1]} : vector<8x186xf32> to vector<8x128xf32>
    %c160 = arith.constant 160 : index
    %c0_23 = arith.constant 0 : index
    %43 = vector.load %arg5[%c160, %c0_23] : memref<472x128xf32, #tpu.memory_space<vmem>>, vector<8x128xf32>
    tpu.vector_store %arg5[%c160, %c0_23], %42 {strides = array<i32>} : memref<472x128xf32, #tpu.memory_space<vmem>>, vector<8x128xf32>,
    %44 = vector.extract_strided_slice %1 {offsets = [0, 21], sizes = [8, 128], strides = [1, 1]} : vector<8x186xf32> to vector<8x128xf32>
    %c168 = arith.constant 168 : index
    %c0_24 = arith.constant 0 : index
    %45 = vector.load %arg5[%c168, %c0_24] : memref<472x128xf32, #tpu.memory_space<vmem>>, vector<8x128xf32>
    tpu.vector_store %arg5[%c168, %c0_24], %44 {strides = array<i32>} : memref<472x128xf32, #tpu.memory_space<vmem>>, vector<8x128xf32>,
    %46 = vector.extract_strided_slice %1 {offsets = [0, 22], sizes = [8, 128], strides = [1, 1]} : vector<8x186xf32> to vector<8x128xf32>
    %c176 = arith.constant 176 : index
    %c0_25 = arith.constant 0 : index
    %47 = vector.load %arg5[%c176, %c0_25] : memref<472x128xf32, #tpu.memory_space<vmem>>, vector<8x128xf32>
    tpu.vector_store %arg5[%c176, %c0_25], %46 {strides = array<i32>} : memref<472x128xf32, #tpu.memory_space<vmem>>, vector<8x128xf32>,
    %48 = vector.extract_strided_slice %1 {offsets = [0, 23], sizes = [8, 128], strides = [1, 1]} : vector<8x186xf32> to vector<8x128xf32>
    %c184 = arith.constant 184 : index
    %c0_26 = arith.constant 0 : index
    %49 = vector.load %arg5[%c184, %c0_26] : memref<472x128xf32, #tpu.memory_space<vmem>>, vector<8x128xf32>
    tpu.vector_store %arg5[%c184, %c0_26], %48 {strides = array<i32>} : memref<472x128xf32, #tpu.memory_space<vmem>>, vector<8x128xf32>,
    %50 = vector.extract_strided_slice %1 {offsets = [0, 24], sizes = [8, 128], strides = [1, 1]} : vector<8x186xf32> to vector<8x128xf32>
    %c192 = arith.constant 192 : index
    %c0_27 = arith.constant 0 : index
    %51 = vector.load %arg5[%c192, %c0_27] : memref<472x128xf32, #tpu.memory_space<vmem>>, vector<8x128xf32>
    tpu.vector_store %arg5[%c192, %c0_27], %50 {strides = array<i32>} : memref<472x128xf32, #tpu.memory_space<vmem>>, vector<8x128xf32>,
    %52 = vector.extract_strided_slice %1 {offsets = [0, 25], sizes = [8, 128], strides = [1, 1]} : vector<8x186xf32> to vector<8x128xf32>
    %c200 = arith.constant 200 : index
    %c0_28 = arith.constant 0 : index
    %53 = vector.load %arg5[%c200, %c0_28] : memref<472x128xf32, #tpu.memory_space<vmem>>, vector<8x128xf32>
    tpu.vector_store %arg5[%c200, %c0_28], %52 {strides = array<i32>} : memref<472x128xf32, #tpu.memory_space<vmem>>, vector<8x128xf32>,
    %54 = vector.extract_strided_slice %1 {offsets = [0, 26], sizes = [8, 128], strides = [1, 1]} : vector<8x186xf32> to vector<8x128xf32>
    %c208 = arith.constant 208 : index
    %c0_29 = arith.constant 0 : index
    %55 = vector.load %arg5[%c208, %c0_29] : memref<472x128xf32, #tpu.memory_space<vmem>>, vector<8x128xf32>
    tpu.vector_store %arg5[%c208, %c0_29], %54 {strides = array<i32>} : memref<472x128xf32, #tpu.memory_space<vmem>>, vector<8x128xf32>,
    %56 = vector.extract_strided_slice %1 {offsets = [0, 27], sizes = [8, 128], strides = [1, 1]} : vector<8x186xf32> to vector<8x128xf32>
    %c216 = arith.constant 216 : index
    %c0_30 = arith.constant 0 : index
    %57 = vector.load %arg5[%c216, %c0_30] : memref<472x128xf32, #tpu.memory_space<vmem>>, vector<8x128xf32>
    tpu.vector_store %arg5[%c216, %c0_30], %56 {strides = array<i32>} : memref<472x128xf32, #tpu.memory_space<vmem>>, vector<8x128xf32>,
    %58 = vector.extract_strided_slice %1 {offsets = [0, 28], sizes = [8, 128], strides = [1, 1]} : vector<8x186xf32> to vector<8x128xf32>
    %c224 = arith.constant 224 : index
    %c0_31 = arith.constant 0 : index
    %59 = vector.load %arg5[%c224, %c0_31] : memref<472x128xf32, #tpu.memory_space<vmem>>, vector<8x128xf32>
    tpu.vector_store %arg5[%c224, %c0_31], %58 {strides = array<i32>} : memref<472x128xf32, #tpu.memory_space<vmem>>, vector<8x128xf32>,
    %60 = vector.extract_strided_slice %1 {offsets = [0, 29], sizes = [8, 128], strides = [1, 1]} : vector<8x186xf32> to vector<8x128xf32>
    %c232 = arith.constant 232 : index
    %c0_32 = arith.constant 0 : index
    %61 = vector.load %arg5[%c232, %c0_32] : memref<472x128xf32, #tpu.memory_space<vmem>>, vector<8x128xf32>
    tpu.vector_store %arg5[%c232, %c0_32], %60 {strides = array<i32>} : memref<472x128xf32, #tpu.memory_space<vmem>>, vector<8x128xf32>,
    %62 = vector.extract_strided_slice %1 {offsets = [0, 30], sizes = [8, 128], strides = [1, 1]} : vector<8x186xf32> to vector<8x128xf32>
    %c240 = arith.constant 240 : index
    %c0_33 = arith.constant 0 : index
    %63 = vector.load %arg5[%c240, %c0_33] : memref<472x128xf32, #tpu.memory_space<vmem>>, vector<8x128xf32>
    tpu.vector_store %arg5[%c240, %c0_33], %62 {strides = array<i32>} : memref<472x128xf32, #tpu.memory_space<vmem>>, vector<8x128xf32>,
    %64 = vector.extract_strided_slice %1 {offsets = [0, 31], sizes = [8, 128], strides = [1, 1]} : vector<8x186xf32> to vector<8x128xf32>
    %c248 = arith.constant 248 : index
    %c0_34 = arith.constant 0 : index
    %65 = vector.load %arg5[%c248, %c0_34] : memref<472x128xf32, #tpu.memory_space<vmem>>, vector<8x128xf32>
    tpu.vector_store %arg5[%c248, %c0_34], %64 {strides = array<i32>} : memref<472x128xf32, #tpu.memory_space<vmem>>, vector<8x128xf32>,
    %66 = vector.extract_strided_slice %1 {offsets = [0, 32], sizes = [8, 128], strides = [1, 1]} : vector<8x186xf32> to vector<8x128xf32>
    %c256 = arith.constant 256 : index
    %c0_35 = arith.constant 0 : index
    %67 = vector.load %arg5[%c256, %c0_35] : memref<472x128xf32, #tpu.memory_space<vmem>>, vector<8x128xf32>
    tpu.vector_store %arg5[%c256, %c0_35], %66 {strides = array<i32>} : memref<472x128xf32, #tpu.memory_space<vmem>>, vector<8x128xf32>,
    %68 = vector.extract_strided_slice %1 {offsets = [0, 33], sizes = [8, 128], strides = [1, 1]} : vector<8x186xf32> to vector<8x128xf32>
    %c264 = arith.constant 264 : index
    %c0_36 = arith.constant 0 : index
    %69 = vector.load %arg5[%c264, %c0_36] : memref<472x128xf32, #tpu.memory_space<vmem>>, vector<8x128xf32>
    tpu.vector_store %arg5[%c264, %c0_36], %68 {strides = array<i32>} : memref<472x128xf32, #tpu.memory_space<vmem>>, vector<8x128xf32>,
    %70 = vector.extract_strided_slice %1 {offsets = [0, 34], sizes = [8, 128], strides = [1, 1]} : vector<8x186xf32> to vector<8x128xf32>
    %c272 = arith.constant 272 : index
    %c0_37 = arith.constant 0 : index
    %71 = vector.load %arg5[%c272, %c0_37] : memref<472x128xf32, #tpu.memory_space<vmem>>, vector<8x128xf32>
    tpu.vector_store %arg5[%c272, %c0_37], %70 {strides = array<i32>} : memref<472x128xf32, #tpu.memory_space<vmem>>, vector<8x128xf32>,
    %72 = vector.extract_strided_slice %1 {offsets = [0, 35], sizes = [8, 128], strides = [1, 1]} : vector<8x186xf32> to vector<8x128xf32>
    %c280 = arith.constant 280 : index
    %c0_38 = arith.constant 0 : index
    %73 = vector.load %arg5[%c280, %c0_38] : memref<472x128xf32, #tpu.memory_space<vmem>>, vector<8x128xf32>
    tpu.vector_store %arg5[%c280, %c0_38], %72 {strides = array<i32>} : memref<472x128xf32, #tpu.memory_space<vmem>>, vector<8x128xf32>,
    %74 = vector.extract_strided_slice %1 {offsets = [0, 36], sizes = [8, 128], strides = [1, 1]} : vector<8x186xf32> to vector<8x128xf32>
    %c288 = arith.constant 288 : index
    %c0_39 = arith.constant 0 : index
    %75 = vector.load %arg5[%c288, %c0_39] : memref<472x128xf32, #tpu.memory_space<vmem>>, vector<8x128xf32>
    tpu.vector_store %arg5[%c288, %c0_39], %74 {strides = array<i32>} : memref<472x128xf32, #tpu.memory_space<vmem>>, vector<8x128xf32>,
    %76 = vector.extract_strided_slice %1 {offsets = [0, 37], sizes = [8, 128], strides = [1, 1]} : vector<8x186xf32> to vector<8x128xf32>
    %c296 = arith.constant 296 : index
    %c0_40 = arith.constant 0 : index
    %77 = vector.load %arg5[%c296, %c0_40] : memref<472x128xf32, #tpu.memory_space<vmem>>, vector<8x128xf32>
    tpu.vector_store %arg5[%c296, %c0_40], %76 {strides = array<i32>} : memref<472x128xf32, #tpu.memory_space<vmem>>, vector<8x128xf32>,
    %78 = vector.extract_strided_slice %1 {offsets = [0, 38], sizes = [8, 128], strides = [1, 1]} : vector<8x186xf32> to vector<8x128xf32>
    %c304 = arith.constant 304 : index
    %c0_41 = arith.constant 0 : index
    %79 = vector.load %arg5[%c304, %c0_41] : memref<472x128xf32, #tpu.memory_space<vmem>>, vector<8x128xf32>
    tpu.vector_store %arg5[%c304, %c0_41], %78 {strides = array<i32>} : memref<472x128xf32, #tpu.memory_space<vmem>>, vector<8x128xf32>,
    %80 = vector.extract_strided_slice %1 {offsets = [0, 39], sizes = [8, 128], strides = [1, 1]} : vector<8x186xf32> to vector<8x128xf32>
    %c312 = arith.constant 312 : index
    %c0_42 = arith.constant 0 : index
    %81 = vector.load %arg5[%c312, %c0_42] : memref<472x128xf32, #tpu.memory_space<vmem>>, vector<8x128xf32>
    tpu.vector_store %arg5[%c312, %c0_42], %80 {strides = array<i32>} : memref<472x128xf32, #tpu.memory_space<vmem>>, vector<8x128xf32>,
    %82 = vector.extract_strided_slice %1 {offsets = [0, 40], sizes = [8, 128], strides = [1, 1]} : vector<8x186xf32> to vector<8x128xf32>
    %c320 = arith.constant 320 : index
    %c0_43 = arith.constant 0 : index
    %83 = vector.load %arg5[%c320, %c0_43] : memref<472x128xf32, #tpu.memory_space<vmem>>, vector<8x128xf32>
    tpu.vector_store %arg5[%c320, %c0_43], %82 {strides = array<i32>} : memref<472x128xf32, #tpu.memory_space<vmem>>, vector<8x128xf32>,
    %84 = vector.extract_strided_slice %1 {offsets = [0, 41], sizes = [8, 128], strides = [1, 1]} : vector<8x186xf32> to vector<8x128xf32>
    %c328 = arith.constant 328 : index
    %c0_44 = arith.constant 0 : index
    %85 = vector.load %arg5[%c328, %c0_44] : memref<472x128xf32, #tpu.memory_space<vmem>>, vector<8x128xf32>
    tpu.vector_store %arg5[%c328, %c0_44], %84 {strides = array<i32>} : memref<472x128xf32, #tpu.memory_space<vmem>>, vector<8x128xf32>,
    %86 = vector.extract_strided_slice %1 {offsets = [0, 42], sizes = [8, 128], strides = [1, 1]} : vector<8x186xf32> to vector<8x128xf32>
    %c336 = arith.constant 336 : index
    %c0_45 = arith.constant 0 : index
    %87 = vector.load %arg5[%c336, %c0_45] : memref<472x128xf32, #tpu.memory_space<vmem>>, vector<8x128xf32>
    tpu.vector_store %arg5[%c336, %c0_45], %86 {strides = array<i32>} : memref<472x128xf32, #tpu.memory_space<vmem>>, vector<8x128xf32>,
    %88 = vector.extract_strided_slice %1 {offsets = [0, 43], sizes = [8, 128], strides = [1, 1]} : vector<8x186xf32> to vector<8x128xf32>
    %c344 = arith.constant 344 : index
    %c0_46 = arith.constant 0 : index
    %89 = vector.load %arg5[%c344, %c0_46] : memref<472x128xf32, #tpu.memory_space<vmem>>, vector<8x128xf32>
    tpu.vector_store %arg5[%c344, %c0_46], %88 {strides = array<i32>} : memref<472x128xf32, #tpu.memory_space<vmem>>, vector<8x128xf32>,
    %90 = vector.extract_strided_slice %1 {offsets = [0, 44], sizes = [8, 128], strides = [1, 1]} : vector<8x186xf32> to vector<8x128xf32>
    %c352 = arith.constant 352 : index
    %c0_47 = arith.constant 0 : index
    %91 = vector.load %arg5[%c352, %c0_47] : memref<472x128xf32, #tpu.memory_space<vmem>>, vector<8x128xf32>
    tpu.vector_store %arg5[%c352, %c0_47], %90 {strides = array<i32>} : memref<472x128xf32, #tpu.memory_space<vmem>>, vector<8x128xf32>,
    %92 = vector.extract_strided_slice %1 {offsets = [0, 45], sizes = [8, 128], strides = [1, 1]} : vector<8x186xf32> to vector<8x128xf32>
    %c360 = arith.constant 360 : index
    %c0_48 = arith.constant 0 : index
    %93 = vector.load %arg5[%c360, %c0_48] : memref<472x128xf32, #tpu.memory_space<vmem>>, vector<8x128xf32>
    tpu.vector_store %arg5[%c360, %c0_48], %92 {strides = array<i32>} : memref<472x128xf32, #tpu.memory_space<vmem>>, vector<8x128xf32>,
    %94 = vector.extract_strided_slice %1 {offsets = [0, 46], sizes = [8, 128], strides = [1, 1]} : vector<8x186xf32> to vector<8x128xf32>
    %c368 = arith.constant 368 : index
    %c0_49 = arith.constant 0 : index
    %95 = vector.load %arg5[%c368, %c0_49] : memref<472x128xf32, #tpu.memory_space<vmem>>, vector<8x128xf32>
    tpu.vector_store %arg5[%c368, %c0_49], %94 {strides = array<i32>} : memref<472x128xf32, #tpu.memory_space<vmem>>, vector<8x128xf32>,
    %96 = vector.extract_strided_slice %1 {offsets = [0, 47], sizes = [8, 128], strides = [1, 1]} : vector<8x186xf32> to vector<8x128xf32>
    %c376 = arith.constant 376 : index
    %c0_50 = arith.constant 0 : index
    %97 = vector.load %arg5[%c376, %c0_50] : memref<472x128xf32, #tpu.memory_space<vmem>>, vector<8x128xf32>
    tpu.vector_store %arg5[%c376, %c0_50], %96 {strides = array<i32>} : memref<472x128xf32, #tpu.memory_space<vmem>>, vector<8x128xf32>,
    %98 = vector.extract_strided_slice %1 {offsets = [0, 48], sizes = [8, 128], strides = [1, 1]} : vector<8x186xf32> to vector<8x128xf32>
    %c384 = arith.constant 384 : index
    %c0_51 = arith.constant 0 : index
    %99 = vector.load %arg5[%c384, %c0_51] : memref<472x128xf32, #tpu.memory_space<vmem>>, vector<8x128xf32>
    tpu.vector_store %arg5[%c384, %c0_51], %98 {strides = array<i32>} : memref<472x128xf32, #tpu.memory_space<vmem>>, vector<8x128xf32>,
    %100 = vector.extract_strided_slice %1 {offsets = [0, 49], sizes = [8, 128], strides = [1, 1]} : vector<8x186xf32> to vector<8x128xf32>
    %c392 = arith.constant 392 : index
    %c0_52 = arith.constant 0 : index
    %101 = vector.load %arg5[%c392, %c0_52] : memref<472x128xf32, #tpu.memory_space<vmem>>, vector<8x128xf32>
    tpu.vector_store %arg5[%c392, %c0_52], %100 {strides = array<i32>} : memref<472x128xf32, #tpu.memory_space<vmem>>, vector<8x128xf32>,
    %102 = vector.extract_strided_slice %1 {offsets = [0, 50], sizes = [8, 128], strides = [1, 1]} : vector<8x186xf32> to vector<8x128xf32>
    %c400 = arith.constant 400 : index
    %c0_53 = arith.constant 0 : index
    %103 = vector.load %arg5[%c400, %c0_53] : memref<472x128xf32, #tpu.memory_space<vmem>>, vector<8x128xf32>
    tpu.vector_store %arg5[%c400, %c0_53], %102 {strides = array<i32>} : memref<472x128xf32, #tpu.memory_space<vmem>>, vector<8x128xf32>,
    %104 = vector.extract_strided_slice %1 {offsets = [0, 51], sizes = [8, 128], strides = [1, 1]} : vector<8x186xf32> to vector<8x128xf32>
    %c408 = arith.constant 408 : index
    %c0_54 = arith.constant 0 : index
    %105 = vector.load %arg5[%c408, %c0_54] : memref<472x128xf32, #tpu.memory_space<vmem>>, vector<8x128xf32>
    tpu.vector_store %arg5[%c408, %c0_54], %104 {strides = array<i32>} : memref<472x128xf32, #tpu.memory_space<vmem>>, vector<8x128xf32>,
    %106 = vector.extract_strided_slice %1 {offsets = [0, 52], sizes = [8, 128], strides = [1, 1]} : vector<8x186xf32> to vector<8x128xf32>
    %c416 = arith.constant 416 : index
    %c0_55 = arith.constant 0 : index
    %107 = vector.load %arg5[%c416, %c0_55] : memref<472x128xf32, #tpu.memory_space<vmem>>, vector<8x128xf32>
    tpu.vector_store %arg5[%c416, %c0_55], %106 {strides = array<i32>} : memref<472x128xf32, #tpu.memory_space<vmem>>, vector<8x128xf32>,
    %108 = vector.extract_strided_slice %1 {offsets = [0, 53], sizes = [8, 128], strides = [1, 1]} : vector<8x186xf32> to vector<8x128xf32>
    %c424 = arith.constant 424 : index
    %c0_56 = arith.constant 0 : index
    %109 = vector.load %arg5[%c424, %c0_56] : memref<472x128xf32, #tpu.memory_space<vmem>>, vector<8x128xf32>
    tpu.vector_store %arg5[%c424, %c0_56], %108 {strides = array<i32>} : memref<472x128xf32, #tpu.memory_space<vmem>>, vector<8x128xf32>,
    %110 = vector.extract_strided_slice %1 {offsets = [0, 54], sizes = [8, 128], strides = [1, 1]} : vector<8x186xf32> to vector<8x128xf32>
    %c432 = arith.constant 432 : index
    %c0_57 = arith.constant 0 : index
    %111 = vector.load %arg5[%c432, %c0_57] : memref<472x128xf32, #tpu.memory_space<vmem>>, vector<8x128xf32>
    tpu.vector_store %arg5[%c432, %c0_57], %110 {strides = array<i32>} : memref<472x128xf32, #tpu.memory_space<vmem>>, vector<8x128xf32>,
    %112 = vector.extract_strided_slice %1 {offsets = [0, 55], sizes = [8, 128], strides = [1, 1]} : vector<8x186xf32> to vector<8x128xf32>
    %c440 = arith.constant 440 : index
    %c0_58 = arith.constant 0 : index
    %113 = vector.load %arg5[%c440, %c0_58] : memref<472x128xf32, #tpu.memory_space<vmem>>, vector<8x128xf32>
    tpu.vector_store %arg5[%c440, %c0_58], %112 {strides = array<i32>} : memref<472x128xf32, #tpu.memory_space<vmem>>, vector<8x128xf32>,
    %114 = vector.extract_strided_slice %1 {offsets = [0, 56], sizes = [8, 128], strides = [1, 1]} : vector<8x186xf32> to vector<8x128xf32>
    %c448 = arith.constant 448 : index
    %c0_59 = arith.constant 0 : index
    %115 = vector.load %arg5[%c448, %c0_59] : memref<472x128xf32, #tpu.memory_space<vmem>>, vector<8x128xf32>
    tpu.vector_store %arg5[%c448, %c0_59], %114 {strides = array<i32>} : memref<472x128xf32, #tpu.memory_space<vmem>>, vector<8x128xf32>,
    %116 = vector.extract_strided_slice %1 {offsets = [0, 57], sizes = [8, 128], strides = [1, 1]} : vector<8x186xf32> to vector<8x128xf32>
    %c456 = arith.constant 456 : index
    %c0_60 = arith.constant 0 : index
    %117 = vector.load %arg5[%c456, %c0_60] : memref<472x128xf32, #tpu.memory_space<vmem>>, vector<8x128xf32>
    tpu.vector_store %arg5[%c456, %c0_60], %116 {strides = array<i32>} : memref<472x128xf32, #tpu.memory_space<vmem>>, vector<8x128xf32>,
    %118 = vector.extract_strided_slice %1 {offsets = [0, 58], sizes = [8, 128], strides = [1, 1]} : vector<8x186xf32> to vector<8x128xf32>
    %c464 = arith.constant 464 : index
    %c0_61 = arith.constant 0 : index
    %119 = vector.load %arg5[%c464, %c0_61] : memref<472x128xf32, #tpu.memory_space<vmem>>, vector<8x128xf32>
    tpu.vector_store %arg5[%c464, %c0_61], %118 {strides = array<i32>} : memref<472x128xf32, #tpu.memory_space<vmem>>, vector<8x128xf32>,
    %c0_62 = arith.constant 0 : index
    %c0_63 = arith.constant 0 : index
    %120 = vector.load %arg2[%c0_62, %c0_63] : memref<8x472xf32, #tpu.memory_space<vmem>>, vector<8x472xf32>
    %c0_64 = arith.constant 0 : index
    %c0_65 = arith.constant 0 : index
    %121 = vector.load %arg5[%c0_64, %c0_65] : memref<472x128xf32, #tpu.memory_space<vmem>>, vector<472x128xf32>
    %cst = arith.constant dense<0.000000e+00> : vector<8x128xf32>
    %122 = tpu.matmul %120, %121, %cst {dimension_numbers = #tpu.dot_dimension_numbers<[1], [0], [0], [1], [0, 0, 1, 1], [], []>} : vector<8x472xf32>, vector<472x128xf32>, vector<8x128xf32> -> vector<8x128xf32>
    %c0_66 = arith.constant 0 : index
    %c0_67 = arith.constant 0 : index
    %123 = vector.load %arg3[%c0_66, %c0_67] : memref<8x1xf32, #tpu.memory_space<vmem>>, vector<8x1xf32>
    %124 = vector.broadcast %123 : vector<8x1xf32> to vector<8x128xf32>
    %125 = arith.addf %122, %124 : vector<8x128xf32>
    %c0_68 = arith.constant 0 : index
    %c0_69 = arith.constant 0 : index
    %c0_70 = arith.constant 0 : index
    %126 = vector.load %arg4[%c0_68, %c0_69, %c0_70] : memref<1x8x128xf32, #tpu.memory_space<vmem>>, vector<1x8x128xf32>
    %127 = vector.shape_cast %126 : vector<1x8x128xf32> to vector<8x128xf32>
    %128 = vector.shape_cast %125 : vector<8x128xf32> to vector<1x8x128xf32>
    tpu.vector_store %arg4[%c0_68, %c0_69, %c0_70], %128 {strides = array<i32>} : memref<1x8x128xf32, #tpu.memory_space<vmem>>, vector<1x8x128xf32>,
    return
  }
  func.func @transform_0(%arg0: i32) -> (i32, i32, i32) {
    %c0_i32 = arith.constant 0 : i32
    %c0_i32_0 = arith.constant 0 : i32
    %c0_i32_1 = arith.constant 0 : i32
    return %arg0, %c0_i32, %c0_i32_0 : i32, i32, i32
  }
  func.func @transform_1(%arg0: i32) -> (i32, i32) {
    %c0_i32 = arith.constant 0 : i32
    %c0_i32_0 = arith.constant 0 : i32
    %c0_i32_1 = arith.constant 0 : i32
    return %c0_i32, %c0_i32_0 : i32, i32
  }
  func.func @transform_2(%arg0: i32) -> (i32, i32) {
    %c0_i32 = arith.constant 0 : i32
    %c0_i32_0 = arith.constant 0 : i32
    %c0_i32_1 = arith.constant 0 : i32
    return %c0_i32, %c0_i32_0 : i32, i32
  }
  func.func @transform_3(%arg0: i32) -> (i32, i32, i32) {
    %c0_i32 = arith.constant 0 : i32
    %c0_i32_0 = arith.constant 0 : i32
    %c0_i32_1 = arith.constant 0 : i32
    return %arg0, %c0_i32, %c0_i32_0 : i32, i32, i32
  }
}

</mosaic_0001>

<bundles_post_ra>
// kernel: tpu_custom_call.1
= control target key start
LH: loop header
LB: loop body
LE: loop exit
PB: predicated region body
PF: predicated region fallthrough
CT: control target
= control target key end

     0   :  { %8 = vsyncpa [#allocation4], 0  ;;  %s2008_s0 = inlined_call_operand.hbm [shape: f32[2,8,186], index: 0, kind: input, shape index: {}]   ;;  %s2009_s1 = inlined_call_operand.hbm [shape: f32[8,472], index: 1, kind: input, shape index: {}]   ;;  %s2010_s2 = inlined_call_operand.vmem [shape: f32[8,1], index: 2, kind: input, shape index: {}]   ;;  %s2011_s3 = inlined_call_operand.hbm [shape: f32[2,8,128], index: 3, kind: output, shape index: {}]  }
   0x1   :  { %10 = vsyncpa [#allocation4 + $0x1], 0 }
   0x2   :  { %11 = vsyncpa [#allocation7], 0 }
   0x3   :  { %12 = vsyncpa [#allocation5], 0 }
   0x4   :  { %14 = vsyncpa [#allocation5 + $0x1], 0  ;;  %s1718_s12 = smov 0   ;;  %s1720_s13 = smov 0  }
   0x5   :  { %s1722_s14 = smov 0   ;;  %s1724_s15 = smov 0  }
   0x6 LB: > { %s1739_s16 = sadd.s32 4294967295, %s1632_s15   ;;  %s976_s17 = sadd.s32 4294967294, %s1632_s15   ;;  %s1632_s15 = sphi %s1724_s15, %s2035_s15   ;;  %s1628_s14 = sphi %s1722_s14, %s2034_s14   ;;  %s1624_s13 = sphi %s1720_s13, %s2033_s13   ;;  %s1620_s12 = sphi %s1718_s12, %s2032_s12  }
   0x7   : > { %p40_p0 = scmp.ne.s32.totalorder %s1624_s13, %s1620_s12  ;;  %p2012_p1 = scmp.eq.s32.totalorder %s1739_s16, 0 }
   0x8   : > { %p112_p3 = scmp.eq.s32.totalorder %s976_s17, 1  ;;  %p977_p5 = scmp.ge.s32.totalorder %s1632_s15, 1 }
   0x9   : > { %p1748_p4 = por %p2012_p1, %p40_p0  ;;  %p119_p7 = scmp.lt.s32.totalorder %s1632_s15, 3 }
   0xa   : > { %p1753_p6 = por %p112_p3, %p40_p0  ;;  %s1634_s21 = smov [#allocation6]  }
   0xb   : > { %s2015_s18 = scalar_select %p1748_p4, 1, 0 }
   0xc   : > { %s2016_s19 = scalar_select %p1753_p6, 1, 0 }
   0xd   : > { %p1758_p8 = pnand %p977_p5, %p119_p7  ;;  %s132_s22 = sshll.u32 %s1634_s21, 4  ;;  %s133_s22 = int_to_ptr.vmem [resolvable:$true] %s132_s22 }
   0xe   : > { %s1766_s23 = sadd.s32 1, %s1632_s15   ;;  %s27_s27 = sadd.s32 1, %s1628_s14 }
   0xf   : > { %s2017_s20 = scalar_select %p1758_p8, 1, 0 }
  0x10   : > { %p1107_p10 = pneg %p1758_p8  ;;  %s24_s25 = ssub.s32 %s1632_s15, %s1766_s23 }
  0x11   : > { %p1776_p12 = scmp.eq.s32.totalorder %s24_s25, 0  ;;  %s1504_s30 = scalar_lea.hbm %s2009_s1, 512 }
  0x12   : > { %p1770_p11 = pnand %p1107_p10, %p2012_p1  ;;  %p1505_p0 = scmp.ne.s32.totalorder %s2009_s1, %s1504_s30 }
  0x13   : > { %s2019_s26 = scalar_select %p1776_p12, 1, 0 }
  0x14   : > { %p1506_p3 = pneg %p1770_p11  ;;  %p1511_p10 = scmp.lt.u32.totalorder %s1504_s30, %s2009_s1 }
  0x16   : > { %p1507_p5 = pnand %p1506_p3, %p1505_p0 }
  0x18   : > { %p1508_p7 = pneg %p1507_p5 }
  0x1a   : > { %p1513_p9 = pnand %p1511_p10, %p1508_p7 }
  0x1c   : > { %1516 = shalt.err (!%p1513_p9)
}
  0x1d   : > { %s1517_s8 = scalar_lea.vmem %s133_s22, 512  ;;  %p1525_p6 = scmp.lt.s32.totalorder %s133_s22, %s133_s22 }
  0x1e   : > { %p1518_p1 = scmp.ne.s32.totalorder %s133_s22, %s1517_s8  ;;  %p1526_p4 = scmp.lt.s32.totalorder %s1517_s8, %s1517_s8 }
  0x20   : > { %p1520_p2 = pnand %p1518_p1, %p1506_p3  ;;  %p1527_p8 = por %p1526_p4, %p1525_p6 }
  0x22   : > { %p1521_p13 = pneg %p1520_p2 }
  0x24   : > { %p1528_p12 = pnand %p1527_p8, %p1521_p13 }
  0x26   : > { %1531 = shalt.err (!%p1528_p12)
}
  0x27   : > { %1110 = dma.hbm_to_vmem [thread:$0]  (!%p1770_p11), %s2009_s1, 512, %s133_s22, [#allocation7]  }
  0x28   : > { %p2020_p1 = scmp.ne.s32.totalorder %s2019_s26, 0  ;;  %p35_p2 = scmp.eq.s32.totalorder %s1632_s15, 0 }
  0x29   : > { %p2021_p4 = scmp.ne.s32.totalorder %s1628_s14, %s1624_s13  ;;  %p2022_p6 = scmp.eq.s32.totalorder %s1739_s16, 1 }
  0x2a   : > { %s1802_s11 = scalar_select %p2020_p1, %s1628_s14, %s27_s27  }
  0x2b   : > { %p1810_p8 = por %p2022_p6, %p2021_p4  ;;  %p1120_p9 = scmp.lt.s32.totalorder %s1632_s15, 2 }
  0x2c   : > { %s146_s21 = sand.u32 1, %s1628_s14   ;;  %p2024_p12 = pmov %p2021_p4 }
  0x2d   : > { %s980_s24 = sshll.u32 %s146_s21, 4  ;;  %s992_s25 = sshll.u32 %s1632_s15, 8 }
  0x2e   : > { %p36_p13 = por %p35_p2, %p2024_p12  ;;  %s1823_s22 = scalar_lea.hbm %s2008_s0, %s992_s25 }
  0x2f   : > { %s150_s26 = scalar_lea.vmem [#allocation3], %s980_s24  ;;  %s147_s4 = scalar_lea.sflag [#allocation4], %s146_s21 }
  0x30   : > { %s158_s27 = sshll.u32 %s150_s26, 4  ;;  %p1825_p11 = pnand %p1120_p9, %p36_p13  ;;  %s1829_s27 = int_to_ptr.vmem [resolvable:$true] %s158_s27 }
  0x31   : > { %s1532_s5 = scalar_lea.hbm %s1823_s22, 256  ;;  %s1537_s8 = scalar_lea.hbm %s2008_s0, 512 }
  0x32   : > { %p1533_p0 = scmp.ne.s32.totalorder %s1823_s22, %s1532_s5  ;;  %p1534_p3 = pneg %p1825_p11 }
  0x33   : > { %p1538_p10 = scmp.lt.u32.totalorder %s1823_s22, %s2008_s0  ;;  %p1539_p1 = scmp.lt.u32.totalorder %s1537_s8, %s1532_s5 }
  0x34   : > { %p1535_p5 = pnand %p1534_p3, %p1533_p0  ;;  %p1541_p4 = scmp.lt.u32.totalorder %s1532_s5, %s1823_s22 }
  0x35   : > { %p1540_p2 = por %p1539_p1, %p1538_p10 }
  0x36   : > { %p1536_p7 = pneg %p1535_p5 }
  0x37   : > { %p1542_p6 = por %p1541_p4, %p1540_p2 }
  0x39   : > { %p1543_p9 = pnand %p1542_p6, %p1536_p7 }
  0x3b   : > { %1546 = shalt.err (!%p1543_p9)
}
  0x3c   : > { %s1547_s21 = scalar_lea.vmem %s1829_s27, 256  ;;  %s1635_s24 = smov [#allocation3]  }
  0x3d   : > { %p1548_p12 = scmp.ne.s32.totalorder %s1829_s27, %s1547_s21  ;;  %s1552_s25 = sshll.u32 %s1635_s24, 4  ;;  %s1553_s25 = int_to_ptr.vmem [resolvable:$false] %s1552_s25 }
  0x3e   : > { %s1554_s28 = scalar_lea.vmem %s1553_s25, 512  ;;  %p1555_p5 = scmp.lt.s32.totalorder %s1829_s27, %s1553_s25 }
  0x3f   : > { %p1550_p13 = pnand %p1548_p12, %p1534_p3  ;;  %p1556_p10 = scmp.lt.s32.totalorder %s1554_s28, %s1547_s21 }
  0x41   : > { %p1551_p0 = pneg %p1550_p13  ;;  %p1557_p1 = por %p1556_p10, %p1555_p5 }
  0x43   : > { %p1558_p2 = pnand %p1557_p1, %p1551_p0 }
  0x45   : > { %1561 = shalt.err (!%p1558_p2)
}
  0x46   : > { %1114 = dma.hbm_to_vmem [thread:$0]  (!%p1825_p11), %s1823_s22, 256, %s1829_s27, %s147_s4  }
  0x47   : > { %p2026_p7 = scmp.ne.s32.totalorder %s2017_s20, 0 }
  0x48   : > { %s1859_s29 = sand.u32 (!%p2026_p7), 1, %s1624_s13   ;;  %p2027_p3 = scmp.ne.s32.totalorder (!%p2026_p7), %s2015_s18, 0 }
  0x49   : > { %167 = sbr.rel (%p2026_p7) target bundleno = 552 (0x228), region = 32  ;;  %s984_s26 = sshll.u32 (!%p2026_p7), %s1859_s29, 4 }
  0x4a   : > { %s170_s5 = scalar_lea.sflag (!%p2026_p7), [#allocation4], %s1859_s29  ;;  %s173_s6 = scalar_lea.vmem (!%p2026_p7), [#allocation3], %s984_s26 }
  0x50   : > { %1607 = dma.done.wait (%p2027_p3), %s170_s5, 256  }
  0x51   : > { %1609 = vsyncadd (%p2027_p3), %s170_s5, 4294967040  ;;  %p2028_p4 = scmp.eq.s32.totalorder %s1739_s16, 0 }
  0x53   : > { %1611 = dma.done.wait (%p2028_p4), [#allocation7], 512   ;;  %p2029_p11 = pmov %p2028_p4 }
  0x54   : > { %v1636_v0 = vmov 0.0|0.0   ;;  %v1872_v1 = vld [vmem:[%s173_s6] sm:$0xff]  ;;  %v1874_v2 = vld [vmem:[%s173_s6 + $0x8] sm:$0xff]  ;;  %s1637_s20 = smov 94   ;;  %s1638_s18 = smov 96   ;;  %vm521_vm0 = vcmask 719872  }
  0x55   : > { %1613 = vsyncadd (%p2029_p11), [#allocation7], 4294966784  ;;  %1060 = vmatprep.subr.bf16.mxu1 %v1636_v0  ;;  %v1878_v3 = vpack.i.bf16 %v1874_v2, %v1872_v1  ;;  %s1639_s22 = smov 93   ;;  %s1640_s27 = smov 95   ;;  %v670_v4 = vld [vmem:[#allocation6 + $0x8] sm:$0xff]  ;;  %v672_v5 = vld [vmem:[#allocation6 + $0x18] sm:$0xff] }
  0x56   : > { %s1641_s30 = smov 91   ;;  %s1642_s4 = smov 92   ;;  %805 = vmatprep.mubr.f32.mxu0 %v670_v4  ;;  %987 = vmatprep.mubr.msk.f32.mxu1 %vm521_vm0, %v672_v5  ;;  %v1693_v6 = vmov 0   ;;  %v732_v7 = vld [vmem:[%s2010_s2] sm:$0xff]  ;;  %vm457_vm1 = vcmask 785408   ;;  %vm465_vm2 = vcmask 777216  }
  0x57   : > { %1228 = vrot.lane.b32.xlu1 %v1878_v3, %s1637_s20  ;;  %1218 = vrot.lane.b32.xlu0 %v1878_v3, %s1638_s18  ;;  %s1643_s7 = smov 89   ;;  %s1644_s8 = smov 90   ;;  %vm473_vm3 = vcmask 769024   ;;  %vm481_vm4 = vcmask 760832   ;;  %vm489_vm5 = vcmask 752640   ;;  %vm497_vm6 = vcmask 744448  }
  0x58   : > { %s1645_s9 = smov 111   ;;  %s1646_s10 = smov 112   ;;  %1502 = vset.pattern.permute.xlu1 %v1693_v6  ;;  %1503 = vset.pattern.permute.xlu0 %v1693_v6  ;;  %vm505_vm7 = vcmask 736256   ;;  %vm513_vm8 = vcmask 728064   ;;  %vm329_vm9 = vcmask 916480   ;;  %vm337_vm10 = vcmask 908288  }
  0x59   : > { %s1647_s21 = smov 87   ;;  %s1648_s24 = smov 88   ;;  %vm529_vm11 = vcmask 711680   ;;  %vm209_vm12 = vcmask 1039360   ;;  %vm345_vm13 = vcmask 900096   ;;  %vm353_vm14 = vcmask 891904  }
  0x5a   : > { %s1649_s25 = smov 127   ;;  %s1650_s28 = smov 110   ;;  %vm537_vm15 = vcmask 703488  }
  0x5b   : > { %1233 = vrot.lane.b32.xlu1 %v1878_v3, %s1639_s22  ;;  %1223 = vrot.lane.b32.xlu0 %v1878_v3, %s1640_s27  ;;  %s1651_s26 = smov 109   ;;  %s1652_s5 = smov 86  }
  0x5c   : > { %s1653_s6 = smov 85   ;;  %s1654_s20 = smov 126  }
  0x5d   : > { %s1655_s18 = smov 125   ;;  %s1656_s22 = smov 108  }
  0x5e   : > { %s1657_s27 = smov 107  }
  0x5f   : > { %1243 = vrot.lane.b32.xlu1 %v1878_v3, %s1641_s30  ;;  %1238 = vrot.lane.b32.xlu0 %v1878_v3, %s1642_s4  ;;  %s1658_s30 = smov 84   ;;  %s1659_s4 = smov 83  }
  0x63   : > { %1253 = vrot.lane.b32.xlu1 %v1878_v3, %s1643_s7  ;;  %1248 = vrot.lane.b32.xlu0 %v1878_v3, %s1644_s8  ;;  %s1660_s7 = smov 124   ;;  %s1661_s8 = smov 123  }
  0x67   : > { %1263 = vrot.lane.b32.xlu1 %v1878_v3, %s1645_s9  ;;  %1258 = vrot.lane.b32.xlu0 %v1878_v3, %s1646_s10  ;;  %s1662_s9 = smov 106   ;;  %s1663_s10 = smov 105  }
  0x6b   : > { %1273 = vrot.lane.b32.xlu1 %v1878_v3, %s1647_s21  ;;  %1268 = vrot.lane.b32.xlu0 %v1878_v3, %s1648_s24  ;;  %s1664_s21 = smov 82   ;;  %s1665_s24 = smov 81  }
  0x6f   : > { %1278 = vrot.lane.b32.xlu0 %v1878_v3, %s1649_s25  ;;  %1283 = vrot.lane.b32.xlu1 %v1878_v3, %s1650_s28  ;;  %s1666_s25 = smov 122   ;;  %s1667_s28 = smov 121  }
  0x73   : > { %1288 = vrot.lane.b32.xlu0 %v1878_v3, %s1651_s26  ;;  %1293 = vrot.lane.b32.xlu1 %v1878_v3, %s1652_s5  ;;  %s1668_s26 = smov 104   ;;  %s1669_s5 = smov 103  }
  0x77   : > { %1298 = vrot.lane.b32.xlu0 %v1878_v3, %s1653_s6  ;;  %1303 = vrot.lane.b32.xlu1 %v1878_v3, %s1654_s20  ;;  %s1670_s6 = smov 80   ;;  %s1671_s20 = smov 79  }
  0x7b   : > { %1308 = vrot.lane.b32.xlu0 %v1878_v3, %s1655_s18  ;;  %1313 = vrot.lane.b32.xlu1 %v1878_v3, %s1656_s22  ;;  %s1672_s18 = smov 120   ;;  %s1673_s22 = smov 119  }
  0x7f   : > { %1318 = vrot.lane.b32.xlu0 %v1878_v3, %s1657_s27  ;;  %1323 = vrot.lane.b32.xlu1 %v1878_v3, %s1658_s30  ;;  %s1674_s27 = smov 102   ;;  %s1675_s30 = smov 101  }
  0x83   : > { %1328 = vrot.lane.b32.xlu0 %v1878_v3, %s1659_s4  ;;  %1333 = vrot.lane.b32.xlu1 %v1878_v3, %s1660_s7  ;;  %s1676_s4 = smov 78   ;;  %s1677_s7 = smov 77  }
  0x87   : > { %1338 = vrot.lane.b32.xlu0 %v1878_v3, %s1661_s8  ;;  %1343 = vrot.lane.b32.xlu1 %v1878_v3, %s1662_s9  ;;  %s1678_s8 = smov 118   ;;  %s1679_s9 = smov 117  }
  0x8b   : > { %1348 = vrot.lane.b32.xlu0 %v1878_v3, %s1663_s10  ;;  %1353 = vrot.lane.b32.xlu1 %v1878_v3, %s1664_s21  ;;  %s1680_s10 = smov 100   ;;  %s1681_s21 = smov 99  }
  0x8f   : > { %1358 = vrot.lane.b32.xlu0 %v1878_v3, %s1665_s24  ;;  %1363 = vrot.lane.b32.xlu1 %v1878_v3, %s1666_s25  ;;  %s1682_s24 = smov 76   ;;  %s1683_s25 = smov 75  }
  0x93   : > { %1368 = vrot.lane.b32.xlu0 %v1878_v3, %s1667_s28  ;;  %1373 = vrot.lane.b32.xlu1 %v1878_v3, %s1668_s26  ;;  %s1684_s28 = smov 116   ;;  %s1685_s26 = smov 115  }
  0x97   : > { %1378 = vrot.lane.b32.xlu0 %v1878_v3, %s1669_s5  ;;  %1383 = vrot.lane.b32.xlu1 %v1878_v3, %s1670_s6  ;;  %s1686_s5 = smov 98   ;;  %s1687_s6 = smov 97  }
  0x9b   : > { %1388 = vrot.lane.b32.xlu0 %v1878_v3, %s1671_s20  ;;  %1393 = vrot.lane.b32.xlu1 %v1878_v3, %s1672_s18  ;;  %s1688_s20 = smov 74   ;;  %s1689_s18 = smov 73  }
  0x9f   : > { %1398 = vrot.lane.b32.xlu0 %v1878_v3, %s1673_s22  ;;  %1403 = vrot.lane.b32.xlu1 %v1878_v3, %s1674_s27  ;;  %s1690_s22 = smov 114   ;;  %s1691_s27 = smov 113  }
  0xa3   : > { %1408 = vrot.lane.b32.xlu0 %v1878_v3, %s1675_s30  ;;  %1413 = vrot.lane.b32.xlu1 %v1878_v3, %s1676_s4  ;;  %s1692_s30 = smov 72   ;;  %s1694_s4 = smov 71  }
  0xa7   : > { %1418 = vrot.lane.b32.xlu0 %v1878_v3, %s1677_s7  ;;  %1423 = vrot.lane.b32.xlu1 %v1878_v3, %s1678_s8  ;;  %s1695_s7 = smov 70  }
  0xab   : > { %1428 = vrot.lane.b32.xlu0 %v1878_v3, %s1679_s9  ;;  %1433 = vrot.lane.b32.xlu1 %v1878_v3, %s1680_s10  ;;  %s986_s10 = sshll.u32 %s1859_s29, 3 }
  0xaf   : > { %1438 = vrot.lane.b32.xlu0 %v1878_v3, %s1681_s21  ;;  %1443 = vrot.lane.b32.xlu1 %v1878_v3, %s1682_s24  ;;  %s989_s21 = sshll.u32 %s1739_s16, 7  ;;  %s199_s24 = scalar_lea.vmem [#allocation8], %s986_s10 }
  0xb0   : > { %s1697_s16 = smov [#allocation8]  }
  0xb3   : > { %1448 = vrot.lane.b32.xlu0 %v1878_v3, %s1683_s25  ;;  %1453 = vrot.lane.b32.xlu1 %v1878_v3, %s1684_s28  ;;  %s896_s25 = sshll.u32 %s199_s24, 4  ;;  %s1966_s25 = int_to_ptr.vmem [resolvable:$true] %s896_s25 }
  0xb7   : > { %1458 = vrot.lane.b32.xlu0 %v1878_v3, %s1685_s26  ;;  %1463 = vrot.lane.b32.xlu1 %v1878_v3, %s1686_s5  ;;  %s1964_s5 = scalar_lea.hbm %s2011_s3, %s989_s21 }
  0xbb   : > { %1468 = vrot.lane.b32.xlu0 %v1878_v3, %s1687_s6  ;;  %1473 = vrot.lane.b32.xlu1 %v1878_v3, %s1688_s20  ;;  %s883_s6 = scalar_lea.sflag [#allocation5], %s1859_s29  ;;  %s1562_s20 = scalar_lea.vmem %s1966_s25, 128 }
  0xbc   : > { %p1563_p6 = scmp.ne.s32.totalorder %s1966_s25, %s1562_s20 }
  0xbe   : > { %p1564_p9 = pnand %p1563_p6, %p1810_p8 }
  0xbf   : > { %1478 = vrot.lane.b32.xlu0 %v1878_v3, %s1689_s18  ;;  %1483 = vrot.lane.b32.xlu1 %v1878_v3, %s1690_s22  ;;  %s1566_s18 = sshll.u32 %s1697_s16, 4  ;;  %s1567_s18 = int_to_ptr.vmem [resolvable:$false] %s1566_s18 }
  0xc0   : > { %p1565_p12 = pneg %p1564_p9  ;;  %s1568_s22 = scalar_lea.vmem %s1567_s18, 256 }
  0xc1   : > { %p1569_p13 = scmp.lt.s32.totalorder %s1966_s25, %s1567_s18  ;;  %p1570_p0 = scmp.lt.s32.totalorder %s1568_s22, %s1562_s20 }
  0xc3   : > { %1488 = vrot.lane.b32.xlu0 %v1878_v3, %s1691_s27  ;;  %1493 = vrot.lane.b32.xlu1 %v1878_v3, %s1692_s30  ;;  %p1571_p5 = por %p1570_p0, %p1569_p13 }
  0xc5   : > { %p1572_p10 = pnand %p1571_p5, %p1565_p12 }
  0xc7   : > { %1498 = vrot.lane.b32.xlu0 %v1878_v3, %s1694_s4  ;;  %661 = vrot.lane.b32.xlu1 %v1872_v1, %s1695_s7 }
  0xc9   : > { %v1229_v8 = vpop.permute.xlu1 %1228  ;;  %v1219_v9 = vpop.permute.xlu0 %1218 }
  0xca   : > { %v1221_v10 = vunpack.i.h.bf16 %v1219_v9  ;;  %v1220_v11 = vunpack.i.l.bf16 %v1219_v9  ;;  %v1231_v12 = vunpack.i.h.bf16 %v1229_v8  ;;  %v1230_v13 = vunpack.i.l.bf16 %v1229_v8 }
  0xcb   : > { %663 = vrot.lane.b32.xlu0 %v1874_v2, %s1695_s7  ;;  %735 = vperm.xlu1 %1502, %v732_v7  }
  0xcc   : > { %v458_v20 = vsel %vm457_vm1, %v1220_v11, %v1221_v10  ;;  %v474_v25 = vsel %vm473_vm3, %v1230_v13, %v1231_v12  ;;  %vm217_vm1 = vcmask 1031168   ;;  %vm361_vm3 = vcmask 883712  }
  0xcd   : > { %v1234_v14 = vpop.permute.xlu1 %1233  ;;  %v1224_v15 = vpop.permute.xlu0 %1223 }
  0xce   : > { %v1236_v16 = vunpack.i.h.bf16 %v1234_v14  ;;  %v1235_v17 = vunpack.i.l.bf16 %v1234_v14  ;;  %v1226_v18 = vunpack.i.h.bf16 %v1224_v15  ;;  %v1225_v19 = vunpack.i.l.bf16 %v1224_v15 }
  0xd0   : > { %v466_v21 = vsel %vm465_vm2, %v1225_v19, %v1226_v18  ;;  %v482_v26 = vsel %vm481_vm4, %v1235_v17, %v1236_v16  ;;  %vm225_vm2 = vcmask 1022976   ;;  %vm369_vm4 = vcmask 875520  }
  0xd1   : > { %v1244_v22 = vpop.permute.xlu1 %1243  ;;  %v1239_v23 = vpop.permute.xlu0 %1238  ;;  %v1061_v24 = vpack.c.bf16 %v466_v21, %v458_v20  ;;  %v1064_v33 = vpack.c.bf16 %v482_v26, %v474_v25 }
  0xd2   : > { %v1246_v27 = vunpack.i.h.bf16 %v1244_v22  ;;  %v1245_v28 = vunpack.i.l.bf16 %v1244_v22  ;;  %v1241_v29 = vunpack.i.h.bf16 %v1239_v23  ;;  %v1240_v30 = vunpack.i.l.bf16 %v1239_v23 }
  0xd3   : > { %1062 = vmatpush1.bf16.msra.mxu1 %v1061_v24 }
  0xd4   : > { %1063 = vmatprep.subr.bf16.mxu1 %v1636_v0  ;;  %v490_v34 = vsel %vm489_vm5, %v1240_v30, %v1241_v29  ;;  %v498_v35 = vsel %vm497_vm6, %v1245_v28, %v1246_v27  ;;  %vm553_vm5 = vcmask 687104   ;;  %vm561_vm6 = vcmask 678912  }
  0xd5   : > { %v1254_v31 = vpop.permute.xlu1 %1253  ;;  %v1249_v32 = vpop.permute.xlu0 %1248  ;;  %v1067_v42 = vpack.c.bf16 %v498_v35, %v490_v34 }
  0xd6   : > { %v1256_v36 = vunpack.i.h.bf16 %v1254_v31  ;;  %v1255_v37 = vunpack.i.l.bf16 %v1254_v31  ;;  %v1251_v38 = vunpack.i.h.bf16 %v1249_v32  ;;  %v1250_v39 = vunpack.i.l.bf16 %v1249_v32 }
  0xd7   : > { %1065 = vmatpush1.bf16.msra.mxu1 %v1064_v33 }
  0xd8   : > { %1066 = vmatprep.subr.bf16.mxu1 %v1636_v0  ;;  %v506_v43 = vsel %vm505_vm7, %v1250_v39, %v1251_v38  ;;  %v514_v44 = vsel %vm513_vm8, %v1255_v37, %v1256_v36  ;;  %vm233_vm7 = vcmask 1014784   ;;  %vm241_vm8 = vcmask 1006592  }
  0xd9   : > { %v1264_v40 = vpop.permute.xlu1 %1263  ;;  %v1259_v41 = vpop.permute.xlu0 %1258  ;;  %v1070_v54 = vpack.c.bf16 %v514_v44, %v506_v43 }
  0xda   : > { %v1266_v45 = vunpack.i.h.bf16 %v1264_v40  ;;  %v1265_v46 = vunpack.i.l.bf16 %v1264_v40  ;;  %v1261_v47 = vunpack.i.h.bf16 %v1259_v41  ;;  %v1260_v48 = vunpack.i.l.bf16 %v1259_v41 }
  0xdb   : > { %1068 = vmatpush1.bf16.msra.mxu1 %v1067_v42 }
  0xdc   : > { %1069 = vmatprep.subr.bf16.mxu1 %v1636_v0  ;;  %v330_v49 = vsel %vm329_vm9, %v1260_v48, %v1261_v47  ;;  %v338_v50 = vsel %vm337_vm10, %v1265_v46, %v1266_v45  ;;  %vm377_vm9 = vcmask 867328   ;;  %vm385_vm10 = vcmask 859136  }
  0xdd   : > { %v1274_v51 = vpop.permute.xlu1 %1273  ;;  %v1269_v52 = vpop.permute.xlu0 %1268  ;;  %v1028_v53 = vpack.c.bf16 %v338_v50, %v330_v49 }
  0xde   : > { %v1276_v55 = vunpack.i.h.bf16 %v1274_v51  ;;  %v1275_v56 = vunpack.i.l.bf16 %v1274_v51  ;;  %v1271_v57 = vunpack.i.h.bf16 %v1269_v52  ;;  %v1270_v58 = vunpack.i.l.bf16 %v1269_v52 }
  0xdf   : > { %1029 = vmatprep.subr.bf16.mxu0 %v1028_v53  ;;  %1071 = vmatpush1.bf16.msra.mxu1 %v1070_v54 }
  0xe0   : > { %1072 = vmatprep.subr.bf16.mxu1 %v1636_v0  ;;  %v522_v59 = vsel %vm521_vm0, %v1270_v58, %v1271_v57  ;;  %v530_v60 = vsel %vm529_vm11, %v1275_v56, %v1276_v55  ;;  %vm545_vm0 = vcmask 695296   ;;  %vm569_vm11 = vcmask 670720  }
  0xe1   : > { %v1279_v61 = vpop.permute.xlu0 %1278  ;;  %v1073_v62 = vpack.c.bf16 %v530_v60, %v522_v59  ;;  %v1284_v63 = vpop.permute.xlu1 %1283 }
  0xe2   : > { %v1281_v2 = vunpack.i.h.bf16 %v1279_v61  ;;  %v1280_v3 = vunpack.i.l.bf16 %v1279_v61  ;;  %v1286_v4 = vunpack.i.h.bf16 %v1284_v63  ;;  %v1285_v5 = vunpack.i.l.bf16 %v1284_v63 }
  0xe3   : > { %1074 = vmatpush1.bf16.msra.mxu1 %v1073_v62 }
  0xe4   : > { %v210_v6 = vsel %vm209_vm12, %v1280_v3, %v1281_v2  ;;  %1075 = vmatprep.subr.bf16.mxu1 %v1636_v0  ;;  %v346_v10 = vsel %vm345_vm13, %v1285_v5, %v1286_v4  ;;  %vm577_vm12 = vcmask 662528   ;;  %vm249_vm13 = vcmask 998400  }
  0xe5   : > { %v1289_v7 = vpop.permute.xlu0 %1288  ;;  %v1030_v8 = vpack.c.bf16 %v210_v6, %v1872_v1  ;;  %v1294_v9 = vpop.permute.xlu1 %1293 }
  0xe6   : > { %v1291_v11 = vunpack.i.h.bf16 %v1289_v7  ;;  %v1290_v12 = vunpack.i.l.bf16 %v1289_v7  ;;  %v1296_v13 = vunpack.i.h.bf16 %v1294_v9  ;;  %v1295_v14 = vunpack.i.l.bf16 %v1294_v9 }
  0xe7   : > { %1031 = vmatpush3.bf16.msra.mxu0 %v1030_v8 }
  0xe8   : > { %v354_v15 = vsel %vm353_vm14, %v1290_v12, %v1291_v11  ;;  %v538_v19 = vsel %vm537_vm15, %v1295_v14, %v1296_v13  ;;  %vm257_vm14 = vcmask 990208   ;;  %vm393_vm15 = vcmask 850944  }
  0xe9   : > { %v1299_v16 = vpop.permute.xlu0 %1298  ;;  %v1032_v17 = vpack.c.bf16 %v354_v15, %v346_v10  ;;  %v1304_v18 = vpop.permute.xlu1 %1303 }
  0xea   : > { %v1301_v20 = vunpack.i.h.bf16 %v1299_v16  ;;  %v1300_v21 = vunpack.i.l.bf16 %v1299_v16  ;;  %v1306_v22 = vunpack.i.h.bf16 %v1304_v18  ;;  %v1305_v1 = vunpack.i.l.bf16 %v1304_v18 }
  0xeb   : > { %1033 = vmatprep.subr.bf16.mxu0 %v1032_v17 }
  0xec   : > { %v546_v23 = vsel %vm545_vm0, %v1300_v21, %v1301_v20  ;;  %v218_v27 = vsel %vm217_vm1, %v1305_v1, %v1306_v22  ;;  %vm401_vm0 = vcmask 842752   ;;  %vm585_vm1 = vcmask 654336  }
  0xed   : > { %v1309_v24 = vpop.permute.xlu0 %1308  ;;  %v1076_v25 = vpack.c.bf16 %v546_v23, %v538_v19  ;;  %v1314_v26 = vpop.permute.xlu1 %1313 }
  0xee   : > { %v1311_v28 = vunpack.i.h.bf16 %v1309_v24  ;;  %v1310_v29 = vunpack.i.l.bf16 %v1309_v24  ;;  %v1316_v30 = vunpack.i.h.bf16 %v1314_v26  ;;  %v1315_v31 = vunpack.i.l.bf16 %v1314_v26 }
  0xef   : > { %1077 = vmatpush1.bf16.msra.mxu1 %v1076_v25 }
  0xf0   : > { %v226_v32 = vsel %vm225_vm2, %v1310_v29, %v1311_v28  ;;  %1078 = vmatprep.subr.bf16.mxu1 %v1636_v0  ;;  %v362_v36 = vsel %vm361_vm3, %v1315_v31, %v1316_v30  ;;  %vm593_vm2 = vcmask 646144   ;;  %vm265_vm3 = vcmask 982016  }
  0xf1   : > { %v1319_v33 = vpop.permute.xlu0 %1318  ;;  %v1034_v34 = vpack.c.bf16 %v226_v32, %v218_v27  ;;  %v1324_v35 = vpop.permute.xlu1 %1323 }
  0xf2   : > { %v1321_v37 = vunpack.i.h.bf16 %v1319_v33  ;;  %v1320_v38 = vunpack.i.l.bf16 %v1319_v33  ;;  %v1326_v39 = vunpack.i.h.bf16 %v1324_v35  ;;  %v1325_v40 = vunpack.i.l.bf16 %v1324_v35 }
  0xf3   : > { %1035 = vmatpush3.bf16.msra.mxu0 %v1034_v34 }
  0xf4   : > { %v370_v41 = vsel %vm369_vm4, %v1320_v38, %v1321_v37  ;;  %v554_v45 = vsel %vm553_vm5, %v1325_v40, %v1326_v39  ;;  %vm273_vm4 = vcmask 973824   ;;  %vm409_vm5 = vcmask 834560  }
  0xf5   : > { %v1329_v42 = vpop.permute.xlu0 %1328  ;;  %v1036_v43 = vpack.c.bf16 %v370_v41, %v362_v36  ;;  %v1334_v44 = vpop.permute.xlu1 %1333 }
  0xf6   : > { %v1331_v46 = vunpack.i.h.bf16 %v1329_v42  ;;  %v1330_v47 = vunpack.i.l.bf16 %v1329_v42  ;;  %v1336_v48 = vunpack.i.h.bf16 %v1334_v44  ;;  %v1335_v49 = vunpack.i.l.bf16 %v1334_v44 }
  0xf7   : > { %1037 = vmatprep.subr.bf16.mxu0 %v1036_v43 }
  0xf8   : > { %v562_v50 = vsel %vm561_vm6, %v1330_v47, %v1331_v46  ;;  %v234_v54 = vsel %vm233_vm7, %v1335_v49, %v1336_v48  ;;  %vm417_vm6 = vcmask 826368   ;;  %vm601_vm7 = vcmask 637952  }
  0xf9   : > { %v1339_v51 = vpop.permute.xlu0 %1338  ;;  %v1079_v52 = vpack.c.bf16 %v562_v50, %v554_v45  ;;  %v1344_v53 = vpop.permute.xlu1 %1343 }
  0xfa   : > { %v1341_v55 = vunpack.i.h.bf16 %v1339_v51  ;;  %v1340_v56 = vunpack.i.l.bf16 %v1339_v51  ;;  %v1346_v57 = vunpack.i.h.bf16 %v1344_v53  ;;  %v1345_v58 = vunpack.i.l.bf16 %v1344_v53 }
  0xfb   : > { %1080 = vmatpush1.bf16.msra.mxu1 %v1079_v52 }
  0xfc   : > { %v242_v59 = vsel %vm241_vm8, %v1340_v56, %v1341_v55  ;;  %1081 = vmatprep.subr.bf16.mxu1 %v1636_v0  ;;  %v378_v63 = vsel %vm377_vm9, %v1345_v58, %v1346_v57  ;;  %vm609_vm8 = vcmask 629760   ;;  %vm281_vm9 = vcmask 965632  }
  0xfd   : > { %v1349_v60 = vpop.permute.xlu0 %1348  ;;  %v1038_v61 = vpack.c.bf16 %v242_v59, %v234_v54  ;;  %v1354_v62 = vpop.permute.xlu1 %1353 }
  0xfe   : > { %v1351_v2 = vunpack.i.h.bf16 %v1349_v60  ;;  %v1350_v3 = vunpack.i.l.bf16 %v1349_v60  ;;  %v1356_v4 = vunpack.i.h.bf16 %v1354_v62  ;;  %v1355_v5 = vunpack.i.l.bf16 %v1354_v62 }
  0xff   : > { %1039 = vmatpush3.bf16.msra.mxu0 %v1038_v61 }
 0x100   : > { %v386_v6 = vsel %vm385_vm10, %v1350_v3, %v1351_v2  ;;  %v570_v10 = vsel %vm569_vm11, %v1355_v5, %v1356_v4  ;;  %vm289_vm10 = vcmask 957440   ;;  %vm425_vm11 = vcmask 818176  }
 0x101   : > { %v1359_v7 = vpop.permute.xlu0 %1358  ;;  %v1040_v8 = vpack.c.bf16 %v386_v6, %v378_v63  ;;  %v1364_v9 = vpop.permute.xlu1 %1363 }
 0x102   : > { %v1361_v11 = vunpack.i.h.bf16 %v1359_v7  ;;  %v1360_v12 = vunpack.i.l.bf16 %v1359_v7  ;;  %v1366_v13 = vunpack.i.h.bf16 %v1364_v9  ;;  %v1365_v14 = vunpack.i.l.bf16 %v1364_v9 }
 0x103   : > { %1041 = vmatprep.subr.bf16.mxu0 %v1040_v8 }
 0x104   : > { %v578_v15 = vsel %vm577_vm12, %v1360_v12, %v1361_v11  ;;  %v250_v19 = vsel %vm249_vm13, %v1365_v14, %v1366_v13  ;;  %vm433_vm12 = vcmask 809984   ;;  %vm617_vm13 = vcmask 621568  }
 0x105   : > { %v1369_v16 = vpop.permute.xlu0 %1368  ;;  %v1082_v17 = vpack.c.bf16 %v578_v15, %v570_v10  ;;  %v1374_v18 = vpop.permute.xlu1 %1373 }
 0x106   : > { %v1371_v20 = vunpack.i.h.bf16 %v1369_v16  ;;  %v1370_v21 = vunpack.i.l.bf16 %v1369_v16  ;;  %v1376_v22 = vunpack.i.h.bf16 %v1374_v18  ;;  %v1375_v1 = vunpack.i.l.bf16 %v1374_v18 }
 0x107   : > { %1083 = vmatpush1.bf16.msra.mxu1 %v1082_v17 }
 0x108   : > { %v258_v23 = vsel %vm257_vm14, %v1370_v21, %v1371_v20  ;;  %1084 = vmatprep.subr.bf16.mxu1 %v1636_v0  ;;  %v394_v27 = vsel %vm393_vm15, %v1375_v1, %v1376_v22  ;;  %vm625_vm14 = vcmask 613376   ;;  %vm297_vm15 = vcmask 949248  }
 0x109   : > { %v1379_v24 = vpop.permute.xlu0 %1378  ;;  %v1042_v25 = vpack.c.bf16 %v258_v23, %v250_v19  ;;  %v1384_v26 = vpop.permute.xlu1 %1383 }
 0x10a   : > { %v1381_v28 = vunpack.i.h.bf16 %v1379_v24  ;;  %v1380_v29 = vunpack.i.l.bf16 %v1379_v24  ;;  %v1386_v30 = vunpack.i.h.bf16 %v1384_v26  ;;  %v1385_v31 = vunpack.i.l.bf16 %v1384_v26 }
 0x10b   : > { %1043 = vmatpush3.bf16.msra.mxu0 %v1042_v25 }
 0x10c   : > { %v402_v32 = vsel %vm401_vm0, %v1380_v29, %v1381_v28  ;;  %v586_v36 = vsel %vm585_vm1, %v1385_v31, %v1386_v30  ;;  %vm305_vm0 = vcmask 941056   ;;  %vm441_vm1 = vcmask 801792  }
 0x10d   : > { %v1389_v33 = vpop.permute.xlu0 %1388  ;;  %v1044_v34 = vpack.c.bf16 %v402_v32, %v394_v27  ;;  %v1394_v35 = vpop.permute.xlu1 %1393 }
 0x10e   : > { %v1391_v37 = vunpack.i.h.bf16 %v1389_v33  ;;  %v1390_v38 = vunpack.i.l.bf16 %v1389_v33  ;;  %v1396_v39 = vunpack.i.h.bf16 %v1394_v35  ;;  %v1395_v40 = vunpack.i.l.bf16 %v1394_v35 }
 0x10f   : > { %1045 = vmatprep.subr.bf16.mxu0 %v1044_v34 }
 0x110   : > { %v594_v41 = vsel %vm593_vm2, %v1390_v38, %v1391_v37  ;;  %v266_v45 = vsel %vm265_vm3, %v1395_v40, %v1396_v39  ;;  %vm449_vm2 = vcmask 793600   ;;  %vm633_vm3 = vcmask 605184  }
 0x111   : > { %v1399_v42 = vpop.permute.xlu0 %1398  ;;  %v1085_v43 = vpack.c.bf16 %v594_v41, %v586_v36  ;;  %v1404_v44 = vpop.permute.xlu1 %1403 }
 0x112   : > { %v1401_v46 = vunpack.i.h.bf16 %v1399_v42  ;;  %v1400_v47 = vunpack.i.l.bf16 %v1399_v42  ;;  %v1406_v48 = vunpack.i.h.bf16 %v1404_v44  ;;  %v1405_v49 = vunpack.i.l.bf16 %v1404_v44 }
 0x113   : > { %1086 = vmatpush1.bf16.msra.mxu1 %v1085_v43 }
 0x114   : > { %v274_v50 = vsel %vm273_vm4, %v1400_v47, %v1401_v46  ;;  %1087 = vmatprep.subr.bf16.mxu1 %v1636_v0  ;;  %v410_v54 = vsel %vm409_vm5, %v1405_v49, %v1406_v48  ;;  %vm641_vm4 = vcmask 596992   ;;  %vm313_vm5 = vcmask 932864  }
 0x115   : > { %v1409_v51 = vpop.permute.xlu0 %1408  ;;  %v1046_v52 = vpack.c.bf16 %v274_v50, %v266_v45  ;;  %v1414_v53 = vpop.permute.xlu1 %1413 }
 0x116   : > { %v1411_v55 = vunpack.i.h.bf16 %v1409_v51  ;;  %v1410_v56 = vunpack.i.l.bf16 %v1409_v51  ;;  %v1416_v57 = vunpack.i.h.bf16 %v1414_v53  ;;  %v1415_v58 = vunpack.i.l.bf16 %v1414_v53 }
 0x117   : > { %1047 = vmatpush3.bf16.msra.mxu0 %v1046_v52 }
 0x118   : > { %v418_v59 = vsel %vm417_vm6, %v1410_v56, %v1411_v55  ;;  %v602_v63 = vsel %vm601_vm7, %v1415_v58, %v1416_v57  ;;  %vm321_vm6 = vcmask 924672   ;;  %vm649_vm7 = vcmask 588800  }
 0x119   : > { %v1419_v60 = vpop.permute.xlu0 %1418  ;;  %v1048_v61 = vpack.c.bf16 %v418_v59, %v410_v54  ;;  %v1424_v62 = vpop.permute.xlu1 %1423 }
 0x11a   : > { %v1421_v2 = vunpack.i.h.bf16 %v1419_v60  ;;  %v1420_v3 = vunpack.i.l.bf16 %v1419_v60  ;;  %v1426_v4 = vunpack.i.h.bf16 %v1424_v62  ;;  %v1425_v5 = vunpack.i.l.bf16 %v1424_v62 }
 0x11b   : > { %1049 = vmatprep.subr.bf16.mxu0 %v1048_v61 }
 0x11c   : > { %v610_v6 = vsel %vm609_vm8, %v1420_v3, %v1421_v2  ;;  %v282_v10 = vsel %vm281_vm9, %v1425_v5, %v1426_v4  ;;  %vm657_vm8 = vcmask 580608   ;;  %vm665_vm9 = vcmask 572416  }
 0x11d   : > { %v1429_v7 = vpop.permute.xlu0 %1428  ;;  %v1088_v8 = vpack.c.bf16 %v610_v6, %v602_v63  ;;  %v1434_v9 = vpop.permute.xlu1 %1433 }
 0x11e   : > { %v1431_v11 = vunpack.i.h.bf16 %v1429_v7  ;;  %v1430_v12 = vunpack.i.l.bf16 %v1429_v7  ;;  %v1436_v13 = vunpack.i.h.bf16 %v1434_v9  ;;  %v1435_v14 = vunpack.i.l.bf16 %v1434_v9 }
 0x11f   : > { %1089 = vmatpush1.bf16.msra.mxu1 %v1088_v8 }
 0x120   : > { %v290_v15 = vsel %vm289_vm10, %v1430_v12, %v1431_v11  ;;  %1090 = vmatprep.subr.bf16.mxu1 %v1636_v0  ;;  %v426_v19 = vsel %vm425_vm11, %v1435_v14, %v1436_v13  ;;  %v669_v12 = vld [vmem:[#allocation6] sm:$0xff] }
 0x121   : > { %v1439_v16 = vpop.permute.xlu0 %1438  ;;  %v1050_v17 = vpack.c.bf16 %v290_v15, %v282_v10  ;;  %v1444_v18 = vpop.permute.xlu1 %1443 }
 0x122   : > { %v1441_v20 = vunpack.i.h.bf16 %v1439_v16  ;;  %v1440_v21 = vunpack.i.l.bf16 %v1439_v16  ;;  %v1446_v22 = vunpack.i.h.bf16 %v1444_v18  ;;  %v1445_v1 = vunpack.i.l.bf16 %v1444_v18  ;;  %v671_v18 = vld [vmem:[#allocation6 + $0x10] sm:$0xff] }
 0x123   : > { %1051 = vmatpush3.bf16.msra.mxu0 %v1050_v17  ;;  %v1696_v17 = vmov 0.0  }
 0x124   : > { %v434_v23 = vsel %vm433_vm12, %v1440_v21, %v1441_v20  ;;  %v618_v27 = vsel %vm617_vm13, %v1445_v1, %v1446_v22 }
 0x125   : > { %v1449_v24 = vpop.permute.xlu0 %1448  ;;  %v1052_v25 = vpack.c.bf16 %v434_v23, %v426_v19  ;;  %v1454_v26 = vpop.permute.xlu1 %1453 }
 0x126   : > { %v1451_v28 = vunpack.i.h.bf16 %v1449_v24  ;;  %v1450_v29 = vunpack.i.l.bf16 %v1449_v24  ;;  %v1456_v30 = vunpack.i.h.bf16 %v1454_v26  ;;  %v1455_v31 = vunpack.i.l.bf16 %v1454_v26 }
 0x127   : > { %1053 = vmatprep.subr.bf16.mxu0 %v1052_v25 }
 0x128   : > { %v626_v32 = vsel %vm625_vm14, %v1450_v29, %v1451_v28  ;;  %v298_v36 = vsel %vm297_vm15, %v1455_v31, %v1456_v30 }
 0x129   : > { %v1459_v33 = vpop.permute.xlu0 %1458  ;;  %v1091_v34 = vpack.c.bf16 %v626_v32, %v618_v27  ;;  %v1464_v35 = vpop.permute.xlu1 %1463 }
 0x12a   : > { %v1461_v37 = vunpack.i.h.bf16 %v1459_v33  ;;  %v1460_v38 = vunpack.i.l.bf16 %v1459_v33  ;;  %v1466_v39 = vunpack.i.h.bf16 %v1464_v35  ;;  %v1465_v40 = vunpack.i.l.bf16 %v1464_v35 }
 0x12b   : > { %1092 = vmatpush1.bf16.msra.mxu1 %v1091_v34 }
 0x12c   : > { %v306_v41 = vsel %vm305_vm0, %v1460_v38, %v1461_v37  ;;  %1093 = vmatprep.subr.bf16.mxu1 %v1636_v0  ;;  %v442_v45 = vsel %vm441_vm1, %v1465_v40, %v1466_v39 }
 0x12d   : > { %v1469_v42 = vpop.permute.xlu0 %1468  ;;  %v1054_v43 = vpack.c.bf16 %v306_v41, %v298_v36  ;;  %v1474_v44 = vpop.permute.xlu1 %1473 }
 0x12e   : > { %v1471_v46 = vunpack.i.h.bf16 %v1469_v42  ;;  %v1470_v47 = vunpack.i.l.bf16 %v1469_v42  ;;  %v1476_v48 = vunpack.i.h.bf16 %v1474_v44  ;;  %v1475_v49 = vunpack.i.l.bf16 %v1474_v44 }
 0x12f   : > { %1055 = vmatpush3.bf16.msra.mxu0 %v1054_v43 }
 0x130   : > { %v450_v50 = vsel %vm449_vm2, %v1470_v47, %v1471_v46  ;;  %v634_v54 = vsel %vm633_vm3, %v1475_v49, %v1476_v48 }
 0x131   : > { %v1479_v51 = vpop.permute.xlu0 %1478  ;;  %v1056_v52 = vpack.c.bf16 %v450_v50, %v442_v45  ;;  %v1484_v53 = vpop.permute.xlu1 %1483 }
 0x132   : > { %v1481_v55 = vunpack.i.h.bf16 %v1479_v51  ;;  %v1480_v56 = vunpack.i.l.bf16 %v1479_v51  ;;  %v1486_v57 = vunpack.i.h.bf16 %v1484_v53  ;;  %v1485_v58 = vunpack.i.l.bf16 %v1484_v53 }
 0x133   : > { %1057 = vmatprep.subr.bf16.mxu0 %v1056_v52 }
 0x134   : > { %v642_v59 = vsel %vm641_vm4, %v1480_v56, %v1481_v55  ;;  %v314_v63 = vsel %vm313_vm5, %v1485_v58, %v1486_v57 }
 0x135   : > { %v1489_v60 = vpop.permute.xlu0 %1488  ;;  %v1094_v61 = vpack.c.bf16 %v642_v59, %v634_v54  ;;  %v1494_v62 = vpop.permute.xlu1 %1493 }
 0x136   : > { %v1491_v2 = vunpack.i.h.bf16 %v1489_v60  ;;  %v1490_v3 = vunpack.i.l.bf16 %v1489_v60  ;;  %v1496_v4 = vunpack.i.h.bf16 %v1494_v62  ;;  %v1495_v5 = vunpack.i.l.bf16 %v1494_v62 }
 0x137   : > { %1095 = vmatpush1.bf16.msra.mxu1 %v1094_v61 }
 0x138   : > { %v322_v6 = vsel %vm321_vm6, %v1490_v3, %v1491_v2  ;;  %1096 = vmatprep.subr.bf16.mxu1 %v1636_v0  ;;  %v650_v11 = vsel %vm649_vm7, %v1495_v5, %v1496_v4 }
 0x139   : > { %v1499_v7 = vpop.permute.xlu0 %1498  ;;  %v1058_v8 = vpack.c.bf16 %v322_v6, %v314_v63  ;;  %v662_v15 = vpop.permute.xlu1 %661 }
 0x13a   : > { %v1501_v9 = vunpack.i.h.bf16 %v1499_v7  ;;  %v1500_v10 = vunpack.i.l.bf16 %v1499_v7 }
 0x13b   : > { %1059 = vmatpush3.bf16.msra.mxu0 %v1058_v8 }
 0x13c   : > { %v658_v13 = vsel %vm657_vm8, %v1500_v10, %v1501_v9 }
 0x13d   : > { %v1097_v14 = vpack.c.bf16 %v658_v13, %v650_v11  ;;  %v664_v16 = vpop.permute.xlu0 %663 }
 0x13e   : > { %806 = vmatmul.mubr.f32.vlgmr.msra.gmra.mrb[0].mxu0 %v669_v12  ;;  %v666_v0 = vsel %vm665_vm9, %v662_v15, %v664_v16 }
 0x13f   : > { %1098 = vmatpush1.bf16.msra.mxu1 %v1097_v14 }
 0x140   : > { %863 = vmatprep.subr.mxu1 %v1696_v17 }
 0x143   : > { %864 = vmatpush1.msra.mxu1 %v666_v0 }
 0x144   : > { %876 = vmatmul.mubr.f32.vlgmr.msra.gmra.mrb[0].mxu1 %v671_v18 }
 0x14a   : > { %v736_v21 = vpop.permute.xlu1 %735 }
 0x211   : > { %v1025_v19 = vpop.f32.mrb[0].mxu0 }
 0x212   : > { %v1026_v20 = vpop.f32.mrb[1].mxu0 }
 0x213   : > { %v1027_v22 = vadd.f32 %v1026_v20, %v1025_v19 }
 0x215   : > { %v808_v1 = vadd.f32 %v1027_v22, %v736_v21 }
 0x217   : > { %v877_v23 = vpop.f32.mrb[0].mxu1 }
 0x218   : > { %v878_v24 = vadd.f32 %v877_v23, %v808_v1  ;;  %v879_v25 = vpop.f32.mrb[1].mxu1 }
 0x21a   : > { %881 = vst [vmem:[%s199_s24] sm:$0xff] %v878_v24 }
 0x21b   : > { %1575 = shalt.err (!%p1572_p10)
}
 0x21c   : > { %s1576_s29 = scalar_lea.hbm %s1964_s5, 128  ;;  %s1580_s4 = scalar_lea.hbm %s2011_s3, 256 }
 0x21d   : > { %p1577_p1 = scmp.ne.s32.totalorder %s1964_s5, %s1576_s29  ;;  %p1581_p3 = scmp.lt.u32.totalorder %s1964_s5, %s2011_s3 }
 0x21e   : > { %p1582_p4 = scmp.lt.u32.totalorder %s1580_s4, %s1576_s29  ;;  %p1584_p6 = scmp.lt.u32.totalorder %s1576_s29, %s1964_s5 }
 0x21f   : > { %p1578_p2 = pnand %p1577_p1, %p1810_p8 }
 0x220   : > { %p1583_p11 = por %p1582_p4, %p1581_p3 }
 0x221   : > { %p1579_p7 = pneg %p1578_p2 }
 0x222   : > { %p1585_p9 = por %p1584_p6, %p1583_p11 }
 0x224   : > { %p1586_p12 = pnand %p1585_p9, %p1579_p7 }
 0x226   : > { %1589 = shalt.err (!%p1586_p12)
}
 0x227   : > { %1105 = dma.vmem_to_hbm [thread:$0]  (%p1810_p8), %s1966_s25, 128, %s1964_s5, %s883_s6  }
 0x228 PF: > { %s908_s9 = sand.u32 1, %s1620_s12   ;;  %p2030_p13 = scmp.ne.s32.totalorder %s2016_s19, 0 }
 0x229   : > { %p2031_p0 = scmp.ge.s32.totalorder %s1632_s15, 2  ;;  %s909_s10 = scalar_lea.sflag [#allocation5], %s908_s9 }
 0x22b   : > { %p1116_p5 = pnand %p2031_p0, %p2030_p13 }
 0x22d   : > { %1615 = dma.done.wait (!%p1116_p5), %s909_s10, 128  }
 0x22e   : > { %1617 = vsyncadd (!%p1116_p5), %s909_s10, 4294967168  ;;  %p17_p10 = scmp.ge.s32.totalorder %s1766_s23, 4   ;;  %s2032_s12 = smov %s1624_s13 }
 0x22f   : > { %s2033_s13 = smov %s1628_s14  ;;  %s2034_s14 = smov %s1802_s11 }
 0x230   : > { %s2035_s15 = smov %s1766_s23  ;;  %19 = sbr.rel (!%p17_p10) target bundleno = 6 (0x6), region = 81 }
 0x237   :  { %914 = vsyncpa [#allocation4], 1 }
 0x238   :  { %916 = vsyncpa [#allocation4 + $0x1], 1 }
 0x239   :  { %917 = vsyncpa [#allocation7], 1 }
 0x23a   :  { %918 = vsyncpa [#allocation5], 1 }
 0x23b   :  { %920 = vsyncpa [#allocation5 + $0x1], 1 }

</bundles_post_ra>
